<compile_context>
chip_gen: v5e
topology: v5e:2x2
jax: 0.10.0
libtpu: 0.0.40
codegen_flags: <defaults>
</compile_context>

<pallas_src>
import functools

import jax
import jax.numpy as jnp
from jax.experimental import pallas as pl
from jax.experimental.pallas import tpu as pltpu

F32 = jnp.float32


# ------------------------------ kernel ------------------------------------

def _elu(v):
    # TODO(synk): exp(x)-1 instead of expm1 (expm1 has no guaranteed Mosaic
    # lowering); absolute error stays ~1 ulp of 1.0 for small negative inputs.
    return jnp.where(v > 0, v, jnp.exp(jnp.minimum(v, 0.0)) - 1.0)


def monet_kernel(x_ref, a1_ref, a2_ref, a3_ref,
                 p1e_ref, p1o_ref, p2e_ref, p2o_ref,
                 g1_ref, rt1_ref, bs1_ref,
                 g2_ref, rt2_ref, bs2_ref,
                 g3_ref, rt3_ref, bs3_ref,
                 fw1_ref, fb1_ref, fw2_ref, fb2_ref,
                 o_ref, *, wgan, inv_n_final):
    k_mix = a1_ref.shape[1]

    # ---- conv1 + ELU (Fin == 1: x * g1[k] is a VPU outer product) ---------
    x = x_ref[0]                                        # (N0, 1)
    a1 = a1_ref[0]                                      # (K, N0, N0)
    g1 = g1_ref[...]                                    # (K, 1, 32)
    acc = x * rt1_ref[...] + bs1_ref[...]               # root + bias, (N0, 32)
    for k in range(k_mix):
        acc = acc + jnp.dot(a1[k], x * g1[k], preferred_element_type=F32)
    x = _elu(acc)

    # ---- pool 1: pairwise max over deterministic clusters ------------------
    # (selection matrices hoisted to the wrapper; matmul cost is negligible
    #  at these sizes and guaranteed to lower)
    x = jnp.maximum(jnp.dot(p1e_ref[...], x, preferred_element_type=F32),
                    jnp.dot(p1o_ref[...], x, preferred_element_type=F32))

    # ---- conv2 + ELU -------------------------------------------------------
    a2 = a2_ref[0]                                      # (K, N1, N1)
    g2 = g2_ref[...]                                    # (K, 32, 64)
    acc = jnp.dot(x, rt2_ref[...], preferred_element_type=F32) + bs2_ref[...]
    for k in range(k_mix):
        acc = acc + jnp.dot(jnp.dot(a2[k], x, preferred_element_type=F32),
                            g2[k], preferred_element_type=F32)
    x = _elu(acc)

    # ---- pool 2 -------------------------------------------------------------
    x = jnp.maximum(jnp.dot(p2e_ref[...], x, preferred_element_type=F32),
                    jnp.dot(p2o_ref[...], x, preferred_element_type=F32))

    # ---- conv3 + ELU --------------------------------------------------------
    a3 = a3_ref[0]                                      # (K, N2, N2)
    g3 = g3_ref[...]                                    # (K, 64, 64)
    acc = jnp.dot(x, rt3_ref[...], preferred_element_type=F32) + bs3_ref[...]
    for k in range(k_mix):
        acc = acc + jnp.dot(jnp.dot(a3[k], x, preferred_element_type=F32),
                            g3[k], preferred_element_type=F32)
    x = _elu(acc)

    # ---- fc1 -> ELU -> dropout(p=0.5, identity at inference) -> fc2
    #      -> global mean pool -> sigmoid -----------------------------------
    h = _elu(jnp.dot(x, fw1_ref[...], preferred_element_type=F32) + fb1_ref[...])
    z = jnp.dot(h, fw2_ref[...], preferred_element_type=F32) + fb2_ref[...]   # (N2, 1)
    y = jnp.sum(z, axis=0, keepdims=True) * inv_n_final                       # (1, 1)
    o_ref[0] = y if wgan else jax.nn.sigmoid(y)


# --------------------- wrapper-side structure precompute -------------------

def _gaussian_mix(ea, mu, sigma):
    """ea (..., 2), mu/sigma (2, K) -> (..., K) GMM kernel weights (PyG GMMConv)."""
    coef = -0.5 / (1e-15 + sigma * sigma)                 # (2, K)
    d = ea[..., None] - mu                                 # (..., 2, K)
    return jnp.exp(jnp.sum(coef * d * d, axis=-2))


def _pair_select(nc, nf):
    """(nc, nf) even / odd selection matrices for the deterministic n->n//2 pool."""
    rows = jnp.arange(nc)[:, None]
    cols = jnp.arange(nf)[None, :]
    return ((cols == 2 * rows).astype(F32), (cols == 2 * rows + 1).astype(F32))


def _mixture_adjacency(adj, pos_c, mu, sigma):
    """adj (G,N,N) 0/1 with adj[g,i,j]=edge j->i, pos_c (G,N,2) ->
    mean-normalized per-mixture weighted adjacency (G,K,N,N), using
    T.Cartesian(norm=True, cat=False) pseudo-coordinates recomputed on the
    coarse graph (batch-wide max, as in the PyTorch reference)."""
    cart = pos_c[:, None, :, :] - pos_c[:, :, None, :]     # [g,i,j,:] = pos[j]-pos[i]
    maxv = jnp.max(jnp.abs(cart) * adj[..., None])
    pseudo = cart / (2.0 * jnp.maximum(maxv, 1e-12)) + 0.5
    w = _gaussian_mix(pseudo, mu, sigma) * adj[..., None]  # (G, N, N, K)
    deg = jnp.sum(adj, axis=2)                              # (G, N) in-degree of i
    w = w / jnp.maximum(deg, 1.0)[:, :, None, None]
    return jnp.transpose(w, (0, 3, 1, 2))                   # (G, K, N, N)


def monet_discriminator_forward(params, x, pos, src, dst, edge_attr, edge_mask,
                                batch, num_graphs, wgan=False):
    n_total = x.shape[0]
    assert n_total % num_graphs == 0, "graphs must have equal node counts"
    n0 = n_total // num_graphs
    assert n0 % 4 == 0, "two deterministic n->n//2 pools need nodes%4==0 per graph"
    n1, n2 = n0 // 2, n0 // 4
    g = num_graphs

    src = jnp.clip(src.astype(jnp.int32), 0, n_total - 1)
    dst = jnp.clip(dst.astype(jnp.int32), 0, n_total - 1)
    m = edge_mask.astype(F32)

    # defensive check: nodes of each graph must be a contiguous equal-size block
    try:
        expected = jnp.repeat(jnp.arange(g, dtype=jnp.int32), n0)
        assert bool(jnp.all(batch.astype(jnp.int32) == expected)), \
            "nodes of each graph must form contiguous equal-sized blocks"
    except jax.errors.ConcretizationTypeError:
        pass  # traced inputs: caller guarantees the layout

    p1, p2, p3 = params["conv1"], params["conv2"], params["conv3"]
    k_mix = p1["mu"].shape[1]

    # ---- level-0 mixture adjacency from dataset pseudo-coords --------------
    e_gid = jnp.clip(src // n0, 0, g - 1)
    src_l = src - e_gid * n0
    dst_l = dst - e_gid * n0
    w0 = _gaussian_mix(edge_attr.astype(F32), p1["mu"], p1["sigma"]) * m[:, None]
    a1 = jnp.zeros((g, n0, n0, k_mix), F32).at[e_gid, dst_l, src_l].add(w0)
    deg0 = jnp.zeros((g, n0), F32).at[e_gid, dst_l].add(m)
    a1 = a1 / jnp.maximum(deg0, 1.0)[:, :, None, None]
    a1 = jnp.transpose(a1, (0, 3, 1, 2))                  # (G, K, N0, N0)

    # ---- graclus substitute + coarse graphs (structure only) ---------------
    # TODO(synk): graclus greedy matching (weighted by normalized_cut_2d) is a
    # sequential, data-dependent algorithm with no clean Pallas/XLA
    # equivalent; a deterministic pairing (node n -> cluster n//2) is used.
    pos_g = pos.astype(F32).reshape(g, n0, 2)
    pos1 = 0.5 * (pos_g[:, 0::2] + pos_g[:, 1::2])        # cluster mean positions
    pos2 = 0.5 * (pos1[:, 0::2] + pos1[:, 1::2])

    # level 1: relabel, drop self loops, coalesce duplicates (wrapper-side)
    adj1 = jnp.zeros((g, n1, n1), F32).at[e_gid, dst_l // 2, src_l // 2].add(m)
    adj1 = jnp.where(adj1 > 0, 1.0, 0.0) * (1.0 - jnp.eye(n1, dtype=F32))
    a2 = _mixture_adjacency(adj1, pos1, p2["mu"], p2["sigma"])   # (G, K, N1, N1)

    # level 2: coarsen the level-1 adjacency
    p1e, p1o = _pair_select(n1, n0)
    p2e, p2o = _pair_select(n2, n1)
    memb = p2e + p2o                                       # (N2, N1) membership
    adj2 = jnp.einsum("ab,gbc,dc->gad", memb, adj1, memb)
    adj2 = jnp.where(adj2 > 0, 1.0, 0.0) * (1.0 - jnp.eye(n2, dtype=F32))
    a3 = _mixture_adjacency(adj2, pos2, p3["mu"], p3["sigma"])   # (G, K, N2, N2)

    # ---- pack kernel inputs -------------------------------------------------
    def g3d(p, fin, fout):
        # (fin, K*fout) -> (K, fin, fout) so g3d[k] == g[:, k*fout:(k+1)*fout]
        return p["g"].reshape(fin, k_mix, fout).transpose(1, 0, 2)

    head = params["head"]
    inputs = [
        x.astype(F32).reshape(g, n0, 1),
        a1, a2, a3,
        p1e, p1o, p2e, p2o,
        g3d(p1, 1, 32), p1["root"], p1["bias"],
        g3d(p2, 32, 64), p2["root"], p2["bias"],
        g3d(p3, 64, 64), p3["root"], p3["bias"],
        head["w1"], head["b1"], head["w2"], head["b2"],
    ]

    in_specs = []
    for idx, arr in enumerate(inputs):
        nd = arr.ndim
        if idx < 4:   # per-graph blocked along the leading graph axis
            in_specs.append(pl.BlockSpec(
                (1,) + arr.shape[1:], lambda gi, nd=nd: (gi,) + (0,) * (nd - 1)))
        else:         # shared weights / selection matrices (block reused per step)
            in_specs.append(pl.BlockSpec(
                arr.shape, lambda gi, nd=nd: (0,) * nd))

    out = pl.pallas_call(
        functools.partial(monet_kernel, wgan=wgan, inv_n_final=1.0 / n2),
        grid=(g,),
        out_shape=jax.ShapeDtypeStruct((g, 1, 1), F32),
        in_specs=in_specs,
        out_specs=pl.BlockSpec((1, 1, 1), lambda gi: (gi, 0, 0)),
        compiler_params=pltpu.CompilerParams(
            dimension_semantics=("parallel",),
            vmem_limit_bytes=32 * 1024 * 1024),
    )(*inputs)
    return out.reshape(g, 1)


# --------------------------- JAX-side utilities ----------------------------

def cartesian_edge_attr(pos, src, dst, edge_mask):
    # dataset-style torch_geometric.transforms.Cartesian(norm=True, cat=False)
    cart = pos[src] - pos[dst]
    maxv = jnp.max(jnp.where(edge_mask[:, None], jnp.abs(cart), 0.0))
    cart = cart / (2.0 * jnp.maximum(maxv, 1e-12)) + 0.5
    return jnp.where(edge_mask[:, None], cart, 0.5)


def init_params(key, kernel_size):
    def conv(k, fin, fout):
        k1, k2, k3, k4 = jax.random.split(k, 4)
        return dict(
            g=jax.random.normal(k1, (fin, kernel_size * fout), F32)
              / jnp.sqrt(float(fin * kernel_size)),
            mu=jax.random.uniform(k2, (2, kernel_size), F32),
            sigma=jax.random.uniform(k3, (2, kernel_size), F32,
                                     minval=0.3, maxval=1.0),
            root=jax.random.normal(k4, (fin, fout), F32) / jnp.sqrt(float(fin)),
            bias=jnp.zeros((1, fout), F32),
        )

    kc1, kc2, kc3, kh1, kh2 = jax.random.split(key, 5)
    return dict(
        conv1=conv(kc1, 1, 32),
        conv2=conv(kc2, 32, 64),
        conv3=conv(kc3, 64, 64),
        head=dict(
            w1=jax.random.normal(kh1, (64, 128), F32) / jnp.sqrt(64.0),
            b1=jnp.zeros((1, 128), F32),
            w2=jax.random.normal(kh2, (128, 1), F32) / jnp.sqrt(128.0),
            b2=jnp.zeros((1, 1), F32),
        ),
    )


if __name__ == "__main__":
    key = jax.random.PRNGKey(0)
    kx, kp, kpos = jax.random.split(key, 3)

    # two 4x4 grid "superpixel" graphs batched together: 32 nodes, 96 directed edges
    n_side, n_graphs = 4, 2
    nodes_per_graph = n_side * n_side
    src_list, dst_list, pos_list, batch_list = [], [], [], []
    for gidx in range(n_graphs):
        off = gidx * nodes_per_graph
        for r in range(n_side):
            for c in range(n_side):
                i = off + r * n_side + c
                pos_list.append((float(c), float(r)))
                batch_list.append(gidx)
                if c + 1 < n_side:
                    src_list += [i, i + 1]; dst_list += [i + 1, i]
                if r + 1 < n_side:
                    src_list += [i, i + n_side]; dst_list += [i + n_side, i]

    src = jnp.asarray(src_list, jnp.int32)
    dst = jnp.asarray(dst_list, jnp.int32)
    pos = jnp.asarray(pos_list, F32)
    pos = pos + 0.1 * jax.random.normal(kpos, pos.shape, F32)   # superpixel jitter
    batch = jnp.asarray(batch_list, jnp.int32)
    edge_mask = jnp.ones((src.shape[0],), dtype=bool)

    x = jax.random.normal(kx, (n_graphs * nodes_per_graph, 1), F32)
    edge_attr = cartesian_edge_attr(pos, src, dst, edge_mask)   # dataset pseudo coords

    params = init_params(kp, kernel_size=8)

    y = monet_discriminator_forward(params, x, pos, src, dst, edge_attr,
                                    edge_mask, batch, num_graphs=n_graphs,
                                    wgan=False)
    y = jax.block_until_ready(y)
    assert y.shape == (n_graphs, 1)
    assert bool(jnp.all(jnp.isfinite(y)))
    print("KERNEL_OK")
</pallas_src>

<mosaic_0001>
module attributes {stable_mosaic.version = 11 : i64} {
  func.func @monet_kernel(%arg0: i32, %arg1: memref<1x16x1xf32, #tpu.memory_space<vmem>>, %arg2: memref<1x8x16x16xf32, #tpu.memory_space<vmem>>, %arg3: memref<1x8x8x8xf32, #tpu.memory_space<vmem>>, %arg4: memref<1x8x4x4xf32, #tpu.memory_space<vmem>>, %arg5: memref<8x16xf32, #tpu.memory_space<vmem>>, %arg6: memref<8x16xf32, #tpu.memory_space<vmem>>, %arg7: memref<4x8xf32, #tpu.memory_space<vmem>>, %arg8: memref<4x8xf32, #tpu.memory_space<vmem>>, %arg9: memref<8x1x32xf32, #tpu.memory_space<vmem>>, %arg10: memref<1x32xf32, #tpu.memory_space<vmem>>, %arg11: memref<1x32xf32, #tpu.memory_space<vmem>>, %arg12: memref<8x32x64xf32, #tpu.memory_space<vmem>>, %arg13: memref<32x64xf32, #tpu.memory_space<vmem>>, %arg14: memref<1x64xf32, #tpu.memory_space<vmem>>, %arg15: memref<8x64x64xf32, #tpu.memory_space<vmem>>, %arg16: memref<64x64xf32, #tpu.memory_space<vmem>>, %arg17: memref<1x64xf32, #tpu.memory_space<vmem>>, %arg18: memref<64x128xf32, #tpu.memory_space<vmem>>, %arg19: memref<1x128xf32, #tpu.memory_space<vmem>>, %arg20: memref<128x1xf32, #tpu.memory_space<vmem>>, %arg21: memref<1x1xf32, #tpu.memory_space<vmem>>, %arg22: memref<1x1x1xf32, #tpu.memory_space<vmem>>) attributes {dimension_semantics = [#tpu.dimension_semantics<parallel>], iteration_bounds = array<i64: 2>, scalar_prefetch = 0 : i64, scratch_operands = 0 : i64, tpu.core_type = #tpu.core_type<tc>, window_params = [{transform_indices = @transform_0, window_bounds = array<i64: 1, 16, 1>}, {transform_indices = @transform_1, window_bounds = array<i64: 1, 8, 16, 16>}, {transform_indices = @transform_2, window_bounds = array<i64: 1, 8, 8, 8>}, {transform_indices = @transform_3, window_bounds = array<i64: 1, 8, 4, 4>}, {pipeline_mode = #tpu.pipeline_mode<synchronous>, transform_indices = @transform_4, window_bounds = array<i64: 8, 16>}, {pipeline_mode = #tpu.pipeline_mode<synchronous>, transform_indices = @transform_5, window_bounds = array<i64: 8, 16>}, {pipeline_mode = #tpu.pipeline_mode<synchronous>, transform_indices = @transform_6, window_bounds = array<i64: 4, 8>}, {pipeline_mode = #tpu.pipeline_mode<synchronous>, transform_indices = @transform_7, window_bounds = array<i64: 4, 8>}, {pipeline_mode = #tpu.pipeline_mode<synchronous>, transform_indices = @transform_8, window_bounds = array<i64: 8, 1, 32>}, {pipeline_mode = #tpu.pipeline_mode<synchronous>, transform_indices = @transform_9, window_bounds = array<i64: 1, 32>}, {pipeline_mode = #tpu.pipeline_mode<synchronous>, transform_indices = @transform_10, window_bounds = array<i64: 1, 32>}, {pipeline_mode = #tpu.pipeline_mode<synchronous>, transform_indices = @transform_11, window_bounds = array<i64: 8, 32, 64>}, {pipeline_mode = #tpu.pipeline_mode<synchronous>, transform_indices = @transform_12, window_bounds = array<i64: 32, 64>}, {pipeline_mode = #tpu.pipeline_mode<synchronous>, transform_indices = @transform_13, window_bounds = array<i64: 1, 64>}, {pipeline_mode = #tpu.pipeline_mode<synchronous>, transform_indices = @transform_14, window_bounds = array<i64: 8, 64, 64>}, {pipeline_mode = #tpu.pipeline_mode<synchronous>, transform_indices = @transform_15, window_bounds = array<i64: 64, 64>}, {pipeline_mode = #tpu.pipeline_mode<synchronous>, transform_indices = @transform_16, window_bounds = array<i64: 1, 64>}, {pipeline_mode = #tpu.pipeline_mode<synchronous>, transform_indices = @transform_17, window_bounds = array<i64: 64, 128>}, {pipeline_mode = #tpu.pipeline_mode<synchronous>, transform_indices = @transform_18, window_bounds = array<i64: 1, 128>}, {pipeline_mode = #tpu.pipeline_mode<synchronous>, transform_indices = @transform_19, window_bounds = array<i64: 128, 1>}, {pipeline_mode = #tpu.pipeline_mode<synchronous>, transform_indices = @transform_20, window_bounds = array<i64: 1, 1>}, {transform_indices = @transform_21, window_bounds = array<i64: 1, 1, 1>}]} {
    %c0 = arith.constant 0 : index
    %c0_0 = arith.constant 0 : index
    %c0_1 = arith.constant 0 : index
    %0 = vector.load %arg1[%c0, %c0_0, %c0_1] : memref<1x16x1xf32, #tpu.memory_space<vmem>>, vector<1x16x1xf32>
    %1 = vector.shape_cast %0 : vector<1x16x1xf32> to vector<16x1xf32>
    %c0_2 = arith.constant 0 : index
    %c0_3 = arith.constant 0 : index
    %c0_4 = arith.constant 0 : index
    %c0_5 = arith.constant 0 : index
    %2 = vector.load %arg2[%c0_2, %c0_3, %c0_4, %c0_5] : memref<1x8x16x16xf32, #tpu.memory_space<vmem>>, vector<1x8x16x16xf32>
    %3 = vector.shape_cast %2 : vector<1x8x16x16xf32> to vector<8x16x16xf32>
    %c0_6 = arith.constant 0 : index
    %c0_7 = arith.constant 0 : index
    %c0_8 = arith.constant 0 : index
    %4 = vector.load %arg9[%c0_6, %c0_7, %c0_8] : memref<8x1x32xf32, #tpu.memory_space<vmem>>, vector<8x1x32xf32>
    %c0_9 = arith.constant 0 : index
    %c0_10 = arith.constant 0 : index
    %5 = vector.load %arg10[%c0_9, %c0_10] : memref<1x32xf32, #tpu.memory_space<vmem>>, vector<1x32xf32>
    %6 = vector.broadcast %1 : vector<16x1xf32> to vector<16x32xf32>
    %7 = vector.broadcast %5 : vector<1x32xf32> to vector<16x32xf32>
    %8 = arith.mulf %6, %7 : vector<16x32xf32>
    %c0_11 = arith.constant 0 : index
    %c0_12 = arith.constant 0 : index
    %9 = vector.load %arg11[%c0_11, %c0_12] : memref<1x32xf32, #tpu.memory_space<vmem>>, vector<1x32xf32>
    %10 = vector.broadcast %9 : vector<1x32xf32> to vector<16x32xf32>
    %11 = arith.addf %8, %10 : vector<16x32xf32>
    %12 = vector.extract_strided_slice %3 {offsets = [0, 0, 0], sizes = [1, 16, 16], strides = [1, 1, 1]} : vector<8x16x16xf32> to vector<1x16x16xf32>
    %13 = vector.shape_cast %12 : vector<1x16x16xf32> to vector<16x16xf32>
    %14 = vector.extract_strided_slice %4 {offsets = [0, 0, 0], sizes = [1, 1, 32], strides = [1, 1, 1]} : vector<8x1x32xf32> to vector<1x1x32xf32>
    %15 = vector.shape_cast %14 : vector<1x1x32xf32> to vector<1x32xf32>
    %16 = vector.broadcast %1 : vector<16x1xf32> to vector<16x32xf32>
    %17 = vector.broadcast %15 : vector<1x32xf32> to vector<16x32xf32>
    %18 = arith.mulf %16, %17 : vector<16x32xf32>
    %cst = arith.constant dense<0.000000e+00> : vector<16x32xf32>
    %19 = tpu.matmul %13, %18, %cst {dimension_numbers = #tpu.dot_dimension_numbers<[1], [0], [0], [1], [0, 0, 1, 1], [], []>} : vector<16x16xf32>, vector<16x32xf32>, vector<16x32xf32> -> vector<16x32xf32>
    %20 = arith.addf %11, %19 : vector<16x32xf32>
    %21 = vector.extract_strided_slice %3 {offsets = [1, 0, 0], sizes = [1, 16, 16], strides = [1, 1, 1]} : vector<8x16x16xf32> to vector<1x16x16xf32>
    %22 = vector.shape_cast %21 : vector<1x16x16xf32> to vector<16x16xf32>
    %23 = vector.extract_strided_slice %4 {offsets = [1, 0, 0], sizes = [1, 1, 32], strides = [1, 1, 1]} : vector<8x1x32xf32> to vector<1x1x32xf32>
    %24 = vector.shape_cast %23 : vector<1x1x32xf32> to vector<1x32xf32>
    %25 = vector.broadcast %1 : vector<16x1xf32> to vector<16x32xf32>
    %26 = vector.broadcast %24 : vector<1x32xf32> to vector<16x32xf32>
    %27 = arith.mulf %25, %26 : vector<16x32xf32>
    %cst_13 = arith.constant dense<0.000000e+00> : vector<16x32xf32>
    %28 = tpu.matmul %22, %27, %cst_13 {dimension_numbers = #tpu.dot_dimension_numbers<[1], [0], [0], [1], [0, 0, 1, 1], [], []>} : vector<16x16xf32>, vector<16x32xf32>, vector<16x32xf32> -> vector<16x32xf32>
    %29 = arith.addf %20, %28 : vector<16x32xf32>
    %30 = vector.extract_strided_slice %3 {offsets = [2, 0, 0], sizes = [1, 16, 16], strides = [1, 1, 1]} : vector<8x16x16xf32> to vector<1x16x16xf32>
    %31 = vector.shape_cast %30 : vector<1x16x16xf32> to vector<16x16xf32>
    %32 = vector.extract_strided_slice %4 {offsets = [2, 0, 0], sizes = [1, 1, 32], strides = [1, 1, 1]} : vector<8x1x32xf32> to vector<1x1x32xf32>
    %33 = vector.shape_cast %32 : vector<1x1x32xf32> to vector<1x32xf32>
    %34 = vector.broadcast %1 : vector<16x1xf32> to vector<16x32xf32>
    %35 = vector.broadcast %33 : vector<1x32xf32> to vector<16x32xf32>
    %36 = arith.mulf %34, %35 : vector<16x32xf32>
    %cst_14 = arith.constant dense<0.000000e+00> : vector<16x32xf32>
    %37 = tpu.matmul %31, %36, %cst_14 {dimension_numbers = #tpu.dot_dimension_numbers<[1], [0], [0], [1], [0, 0, 1, 1], [], []>} : vector<16x16xf32>, vector<16x32xf32>, vector<16x32xf32> -> vector<16x32xf32>
    %38 = arith.addf %29, %37 : vector<16x32xf32>
    %39 = vector.extract_strided_slice %3 {offsets = [3, 0, 0], sizes = [1, 16, 16], strides = [1, 1, 1]} : vector<8x16x16xf32> to vector<1x16x16xf32>
    %40 = vector.shape_cast %39 : vector<1x16x16xf32> to vector<16x16xf32>
    %41 = vector.extract_strided_slice %4 {offsets = [3, 0, 0], sizes = [1, 1, 32], strides = [1, 1, 1]} : vector<8x1x32xf32> to vector<1x1x32xf32>
    %42 = vector.shape_cast %41 : vector<1x1x32xf32> to vector<1x32xf32>
    %43 = vector.broadcast %1 : vector<16x1xf32> to vector<16x32xf32>
    %44 = vector.broadcast %42 : vector<1x32xf32> to vector<16x32xf32>
    %45 = arith.mulf %43, %44 : vector<16x32xf32>
    %cst_15 = arith.constant dense<0.000000e+00> : vector<16x32xf32>
    %46 = tpu.matmul %40, %45, %cst_15 {dimension_numbers = #tpu.dot_dimension_numbers<[1], [0], [0], [1], [0, 0, 1, 1], [], []>} : vector<16x16xf32>, vector<16x32xf32>, vector<16x32xf32> -> vector<16x32xf32>
    %47 = arith.addf %38, %46 : vector<16x32xf32>
    %48 = vector.extract_strided_slice %3 {offsets = [4, 0, 0], sizes = [1, 16, 16], strides = [1, 1, 1]} : vector<8x16x16xf32> to vector<1x16x16xf32>
    %49 = vector.shape_cast %48 : vector<1x16x16xf32> to vector<16x16xf32>
    %50 = vector.extract_strided_slice %4 {offsets = [4, 0, 0], sizes = [1, 1, 32], strides = [1, 1, 1]} : vector<8x1x32xf32> to vector<1x1x32xf32>
    %51 = vector.shape_cast %50 : vector<1x1x32xf32> to vector<1x32xf32>
    %52 = vector.broadcast %1 : vector<16x1xf32> to vector<16x32xf32>
    %53 = vector.broadcast %51 : vector<1x32xf32> to vector<16x32xf32>
    %54 = arith.mulf %52, %53 : vector<16x32xf32>
    %cst_16 = arith.constant dense<0.000000e+00> : vector<16x32xf32>
    %55 = tpu.matmul %49, %54, %cst_16 {dimension_numbers = #tpu.dot_dimension_numbers<[1], [0], [0], [1], [0, 0, 1, 1], [], []>} : vector<16x16xf32>, vector<16x32xf32>, vector<16x32xf32> -> vector<16x32xf32>
    %56 = arith.addf %47, %55 : vector<16x32xf32>
    %57 = vector.extract_strided_slice %3 {offsets = [5, 0, 0], sizes = [1, 16, 16], strides = [1, 1, 1]} : vector<8x16x16xf32> to vector<1x16x16xf32>
    %58 = vector.shape_cast %57 : vector<1x16x16xf32> to vector<16x16xf32>
    %59 = vector.extract_strided_slice %4 {offsets = [5, 0, 0], sizes = [1, 1, 32], strides = [1, 1, 1]} : vector<8x1x32xf32> to vector<1x1x32xf32>
    %60 = vector.shape_cast %59 : vector<1x1x32xf32> to vector<1x32xf32>
    %61 = vector.broadcast %1 : vector<16x1xf32> to vector<16x32xf32>
    %62 = vector.broadcast %60 : vector<1x32xf32> to vector<16x32xf32>
    %63 = arith.mulf %61, %62 : vector<16x32xf32>
    %cst_17 = arith.constant dense<0.000000e+00> : vector<16x32xf32>
    %64 = tpu.matmul %58, %63, %cst_17 {dimension_numbers = #tpu.dot_dimension_numbers<[1], [0], [0], [1], [0, 0, 1, 1], [], []>} : vector<16x16xf32>, vector<16x32xf32>, vector<16x32xf32> -> vector<16x32xf32>
    %65 = arith.addf %56, %64 : vector<16x32xf32>
    %66 = vector.extract_strided_slice %3 {offsets = [6, 0, 0], sizes = [1, 16, 16], strides = [1, 1, 1]} : vector<8x16x16xf32> to vector<1x16x16xf32>
    %67 = vector.shape_cast %66 : vector<1x16x16xf32> to vector<16x16xf32>
    %68 = vector.extract_strided_slice %4 {offsets = [6, 0, 0], sizes = [1, 1, 32], strides = [1, 1, 1]} : vector<8x1x32xf32> to vector<1x1x32xf32>
    %69 = vector.shape_cast %68 : vector<1x1x32xf32> to vector<1x32xf32>
    %70 = vector.broadcast %1 : vector<16x1xf32> to vector<16x32xf32>
    %71 = vector.broadcast %69 : vector<1x32xf32> to vector<16x32xf32>
    %72 = arith.mulf %70, %71 : vector<16x32xf32>
    %cst_18 = arith.constant dense<0.000000e+00> : vector<16x32xf32>
    %73 = tpu.matmul %67, %72, %cst_18 {dimension_numbers = #tpu.dot_dimension_numbers<[1], [0], [0], [1], [0, 0, 1, 1], [], []>} : vector<16x16xf32>, vector<16x32xf32>, vector<16x32xf32> -> vector<16x32xf32>
    %74 = arith.addf %65, %73 : vector<16x32xf32>
    %75 = vector.extract_strided_slice %3 {offsets = [7, 0, 0], sizes = [1, 16, 16], strides = [1, 1, 1]} : vector<8x16x16xf32> to vector<1x16x16xf32>
    %76 = vector.shape_cast %75 : vector<1x16x16xf32> to vector<16x16xf32>
    %77 = vector.extract_strided_slice %4 {offsets = [7, 0, 0], sizes = [1, 1, 32], strides = [1, 1, 1]} : vector<8x1x32xf32> to vector<1x1x32xf32>
    %78 = vector.shape_cast %77 : vector<1x1x32xf32> to vector<1x32xf32>
    %79 = vector.broadcast %1 : vector<16x1xf32> to vector<16x32xf32>
    %80 = vector.broadcast %78 : vector<1x32xf32> to vector<16x32xf32>
    %81 = arith.mulf %79, %80 : vector<16x32xf32>
    %cst_19 = arith.constant dense<0.000000e+00> : vector<16x32xf32>
    %82 = tpu.matmul %76, %81, %cst_19 {dimension_numbers = #tpu.dot_dimension_numbers<[1], [0], [0], [1], [0, 0, 1, 1], [], []>} : vector<16x16xf32>, vector<16x32xf32>, vector<16x32xf32> -> vector<16x32xf32>
    %83 = arith.addf %74, %82 : vector<16x32xf32>
    %cst_20 = arith.constant 0.000000e+00 : f32
    %84 = vector.broadcast %cst_20 : f32 to vector<16x32xf32>
    %85 = arith.cmpf ogt, %83, %84 : vector<16x32xf32>
    %cst_21 = arith.constant 0.000000e+00 : f32
    %86 = vector.broadcast %cst_21 : f32 to vector<16x32xf32>
    %87 = arith.minimumf %83, %86 : vector<16x32xf32>
    %88 = math.exp %87 : vector<16x32xf32>
    %cst_22 = arith.constant 1.000000e+00 : f32
    %89 = vector.broadcast %cst_22 : f32 to vector<16x32xf32>
    %90 = arith.subf %88, %89 : vector<16x32xf32>
    %91 = arith.select %85, %83, %90 : vector<16x32xi1>, vector<16x32xf32>
    %c0_23 = arith.constant 0 : index
    %c0_24 = arith.constant 0 : index
    %92 = vector.load %arg5[%c0_23, %c0_24] : memref<8x16xf32, #tpu.memory_space<vmem>>, vector<8x16xf32>
    %cst_25 = arith.constant dense<0.000000e+00> : vector<8x32xf32>
    %93 = tpu.matmul %92, %91, %cst_25 {dimension_numbers = #tpu.dot_dimension_numbers<[1], [0], [0], [1], [0, 0, 1, 1], [], []>} : vector<8x16xf32>, vector<16x32xf32>, vector<8x32xf32> -> vector<8x32xf32>
    %c0_26 = arith.constant 0 : index
    %c0_27 = arith.constant 0 : index
    %94 = vector.load %arg6[%c0_26, %c0_27] : memref<8x16xf32, #tpu.memory_space<vmem>>, vector<8x16xf32>
    %cst_28 = arith.constant dense<0.000000e+00> : vector<8x32xf32>
    %95 = tpu.matmul %94, %91, %cst_28 {dimension_numbers = #tpu.dot_dimension_numbers<[1], [0], [0], [1], [0, 0, 1, 1], [], []>} : vector<8x16xf32>, vector<16x32xf32>, vector<8x32xf32> -> vector<8x32xf32>
    %96 = arith.maximumf %93, %95 : vector<8x32xf32>
    %c0_29 = arith.constant 0 : index
    %c0_30 = arith.constant 0 : index
    %c0_31 = arith.constant 0 : index
    %c0_32 = arith.constant 0 : index
    %97 = vector.load %arg3[%c0_29, %c0_30, %c0_31, %c0_32] : memref<1x8x8x8xf32, #tpu.memory_space<vmem>>, vector<1x8x8x8xf32>
    %98 = vector.shape_cast %97 : vector<1x8x8x8xf32> to vector<8x8x8xf32>
    %c0_33 = arith.constant 0 : index
    %c0_34 = arith.constant 0 : index
    %c0_35 = arith.constant 0 : index
    %99 = vector.load %arg12[%c0_33, %c0_34, %c0_35] : memref<8x32x64xf32, #tpu.memory_space<vmem>>, vector<8x32x64xf32>
    %c0_36 = arith.constant 0 : index
    %c0_37 = arith.constant 0 : index
    %100 = vector.load %arg13[%c0_36, %c0_37] : memref<32x64xf32, #tpu.memory_space<vmem>>, vector<32x64xf32>
    %cst_38 = arith.constant dense<0.000000e+00> : vector<8x64xf32>
    %101 = tpu.matmul %96, %100, %cst_38 {dimension_numbers = #tpu.dot_dimension_numbers<[1], [0], [0], [1], [0, 0, 1, 1], [], []>} : vector<8x32xf32>, vector<32x64xf32>, vector<8x64xf32> -> vector<8x64xf32>
    %c0_39 = arith.constant 0 : index
    %c0_40 = arith.constant 0 : index
    %102 = vector.load %arg14[%c0_39, %c0_40] : memref<1x64xf32, #tpu.memory_space<vmem>>, vector<1x64xf32>
    %103 = vector.broadcast %102 : vector<1x64xf32> to vector<8x64xf32>
    %104 = arith.addf %101, %103 : vector<8x64xf32>
    %105 = vector.extract_strided_slice %98 {offsets = [0, 0, 0], sizes = [1, 8, 8], strides = [1, 1, 1]} : vector<8x8x8xf32> to vector<1x8x8xf32>
    %106 = vector.shape_cast %105 : vector<1x8x8xf32> to vector<8x8xf32>
    %cst_41 = arith.constant dense<0.000000e+00> : vector<8x32xf32>
    %107 = tpu.matmul %106, %96, %cst_41 {dimension_numbers = #tpu.dot_dimension_numbers<[1], [0], [0], [1], [0, 0, 1, 1], [], []>} : vector<8x8xf32>, vector<8x32xf32>, vector<8x32xf32> -> vector<8x32xf32>
    %108 = vector.extract_strided_slice %99 {offsets = [0, 0, 0], sizes = [1, 32, 64], strides = [1, 1, 1]} : vector<8x32x64xf32> to vector<1x32x64xf32>
    %109 = vector.shape_cast %108 : vector<1x32x64xf32> to vector<32x64xf32>
    %cst_42 = arith.constant dense<0.000000e+00> : vector<8x64xf32>
    %110 = tpu.matmul %107, %109, %cst_42 {dimension_numbers = #tpu.dot_dimension_numbers<[1], [0], [0], [1], [0, 0, 1, 1], [], []>} : vector<8x32xf32>, vector<32x64xf32>, vector<8x64xf32> -> vector<8x64xf32>
    %111 = arith.addf %104, %110 : vector<8x64xf32>
    %112 = vector.extract_strided_slice %98 {offsets = [1, 0, 0], sizes = [1, 8, 8], strides = [1, 1, 1]} : vector<8x8x8xf32> to vector<1x8x8xf32>
    %113 = vector.shape_cast %112 : vector<1x8x8xf32> to vector<8x8xf32>
    %cst_43 = arith.constant dense<0.000000e+00> : vector<8x32xf32>
    %114 = tpu.matmul %113, %96, %cst_43 {dimension_numbers = #tpu.dot_dimension_numbers<[1], [0], [0], [1], [0, 0, 1, 1], [], []>} : vector<8x8xf32>, vector<8x32xf32>, vector<8x32xf32> -> vector<8x32xf32>
    %115 = vector.extract_strided_slice %99 {offsets = [1, 0, 0], sizes = [1, 32, 64], strides = [1, 1, 1]} : vector<8x32x64xf32> to vector<1x32x64xf32>
    %116 = vector.shape_cast %115 : vector<1x32x64xf32> to vector<32x64xf32>
    %cst_44 = arith.constant dense<0.000000e+00> : vector<8x64xf32>
    %117 = tpu.matmul %114, %116, %cst_44 {dimension_numbers = #tpu.dot_dimension_numbers<[1], [0], [0], [1], [0, 0, 1, 1], [], []>} : vector<8x32xf32>, vector<32x64xf32>, vector<8x64xf32> -> vector<8x64xf32>
    %118 = arith.addf %111, %117 : vector<8x64xf32>
    %119 = vector.extract_strided_slice %98 {offsets = [2, 0, 0], sizes = [1, 8, 8], strides = [1, 1, 1]} : vector<8x8x8xf32> to vector<1x8x8xf32>
    %120 = vector.shape_cast %119 : vector<1x8x8xf32> to vector<8x8xf32>
    %cst_45 = arith.constant dense<0.000000e+00> : vector<8x32xf32>
    %121 = tpu.matmul %120, %96, %cst_45 {dimension_numbers = #tpu.dot_dimension_numbers<[1], [0], [0], [1], [0, 0, 1, 1], [], []>} : vector<8x8xf32>, vector<8x32xf32>, vector<8x32xf32> -> vector<8x32xf32>
    %122 = vector.extract_strided_slice %99 {offsets = [2, 0, 0], sizes = [1, 32, 64], strides = [1, 1, 1]} : vector<8x32x64xf32> to vector<1x32x64xf32>
    %123 = vector.shape_cast %122 : vector<1x32x64xf32> to vector<32x64xf32>
    %cst_46 = arith.constant dense<0.000000e+00> : vector<8x64xf32>
    %124 = tpu.matmul %121, %123, %cst_46 {dimension_numbers = #tpu.dot_dimension_numbers<[1], [0], [0], [1], [0, 0, 1, 1], [], []>} : vector<8x32xf32>, vector<32x64xf32>, vector<8x64xf32> -> vector<8x64xf32>
    %125 = arith.addf %118, %124 : vector<8x64xf32>
    %126 = vector.extract_strided_slice %98 {offsets = [3, 0, 0], sizes = [1, 8, 8], strides = [1, 1, 1]} : vector<8x8x8xf32> to vector<1x8x8xf32>
    %127 = vector.shape_cast %126 : vector<1x8x8xf32> to vector<8x8xf32>
    %cst_47 = arith.constant dense<0.000000e+00> : vector<8x32xf32>
    %128 = tpu.matmul %127, %96, %cst_47 {dimension_numbers = #tpu.dot_dimension_numbers<[1], [0], [0], [1], [0, 0, 1, 1], [], []>} : vector<8x8xf32>, vector<8x32xf32>, vector<8x32xf32> -> vector<8x32xf32>
    %129 = vector.extract_strided_slice %99 {offsets = [3, 0, 0], sizes = [1, 32, 64], strides = [1, 1, 1]} : vector<8x32x64xf32> to vector<1x32x64xf32>
    %130 = vector.shape_cast %129 : vector<1x32x64xf32> to vector<32x64xf32>
    %cst_48 = arith.constant dense<0.000000e+00> : vector<8x64xf32>
    %131 = tpu.matmul %128, %130, %cst_48 {dimension_numbers = #tpu.dot_dimension_numbers<[1], [0], [0], [1], [0, 0, 1, 1], [], []>} : vector<8x32xf32>, vector<32x64xf32>, vector<8x64xf32> -> vector<8x64xf32>
    %132 = arith.addf %125, %131 : vector<8x64xf32>
    %133 = vector.extract_strided_slice %98 {offsets = [4, 0, 0], sizes = [1, 8, 8], strides = [1, 1, 1]} : vector<8x8x8xf32> to vector<1x8x8xf32>
    %134 = vector.shape_cast %133 : vector<1x8x8xf32> to vector<8x8xf32>
    %cst_49 = arith.constant dense<0.000000e+00> : vector<8x32xf32>
    %135 = tpu.matmul %134, %96, %cst_49 {dimension_numbers = #tpu.dot_dimension_numbers<[1], [0], [0], [1], [0, 0, 1, 1], [], []>} : vector<8x8xf32>, vector<8x32xf32>, vector<8x32xf32> -> vector<8x32xf32>
    %136 = vector.extract_strided_slice %99 {offsets = [4, 0, 0], sizes = [1, 32, 64], strides = [1, 1, 1]} : vector<8x32x64xf32> to vector<1x32x64xf32>
    %137 = vector.shape_cast %136 : vector<1x32x64xf32> to vector<32x64xf32>
    %cst_50 = arith.constant dense<0.000000e+00> : vector<8x64xf32>
    %138 = tpu.matmul %135, %137, %cst_50 {dimension_numbers = #tpu.dot_dimension_numbers<[1], [0], [0], [1], [0, 0, 1, 1], [], []>} : vector<8x32xf32>, vector<32x64xf32>, vector<8x64xf32> -> vector<8x64xf32>
    %139 = arith.addf %132, %138 : vector<8x64xf32>
    %140 = vector.extract_strided_slice %98 {offsets = [5, 0, 0], sizes = [1, 8, 8], strides = [1, 1, 1]} : vector<8x8x8xf32> to vector<1x8x8xf32>
    %141 = vector.shape_cast %140 : vector<1x8x8xf32> to vector<8x8xf32>
    %cst_51 = arith.constant dense<0.000000e+00> : vector<8x32xf32>
    %142 = tpu.matmul %141, %96, %cst_51 {dimension_numbers = #tpu.dot_dimension_numbers<[1], [0], [0], [1], [0, 0, 1, 1], [], []>} : vector<8x8xf32>, vector<8x32xf32>, vector<8x32xf32> -> vector<8x32xf32>
    %143 = vector.extract_strided_slice %99 {offsets = [5, 0, 0], sizes = [1, 32, 64], strides = [1, 1, 1]} : vector<8x32x64xf32> to vector<1x32x64xf32>
    %144 = vector.shape_cast %143 : vector<1x32x64xf32> to vector<32x64xf32>
    %cst_52 = arith.constant dense<0.000000e+00> : vector<8x64xf32>
    %145 = tpu.matmul %142, %144, %cst_52 {dimension_numbers = #tpu.dot_dimension_numbers<[1], [0], [0], [1], [0, 0, 1, 1], [], []>} : vector<8x32xf32>, vector<32x64xf32>, vector<8x64xf32> -> vector<8x64xf32>
    %146 = arith.addf %139, %145 : vector<8x64xf32>
    %147 = vector.extract_strided_slice %98 {offsets = [6, 0, 0], sizes = [1, 8, 8], strides = [1, 1, 1]} : vector<8x8x8xf32> to vector<1x8x8xf32>
    %148 = vector.shape_cast %147 : vector<1x8x8xf32> to vector<8x8xf32>
    %cst_53 = arith.constant dense<0.000000e+00> : vector<8x32xf32>
    %149 = tpu.matmul %148, %96, %cst_53 {dimension_numbers = #tpu.dot_dimension_numbers<[1], [0], [0], [1], [0, 0, 1, 1], [], []>} : vector<8x8xf32>, vector<8x32xf32>, vector<8x32xf32> -> vector<8x32xf32>
    %150 = vector.extract_strided_slice %99 {offsets = [6, 0, 0], sizes = [1, 32, 64], strides = [1, 1, 1]} : vector<8x32x64xf32> to vector<1x32x64xf32>
    %151 = vector.shape_cast %150 : vector<1x32x64xf32> to vector<32x64xf32>
    %cst_54 = arith.constant dense<0.000000e+00> : vector<8x64xf32>
    %152 = tpu.matmul %149, %151, %cst_54 {dimension_numbers = #tpu.dot_dimension_numbers<[1], [0], [0], [1], [0, 0, 1, 1], [], []>} : vector<8x32xf32>, vector<32x64xf32>, vector<8x64xf32> -> vector<8x64xf32>
    %153 = arith.addf %146, %152 : vector<8x64xf32>
    %154 = vector.extract_strided_slice %98 {offsets = [7, 0, 0], sizes = [1, 8, 8], strides = [1, 1, 1]} : vector<8x8x8xf32> to vector<1x8x8xf32>
    %155 = vector.shape_cast %154 : vector<1x8x8xf32> to vector<8x8xf32>
    %cst_55 = arith.constant dense<0.000000e+00> : vector<8x32xf32>
    %156 = tpu.matmul %155, %96, %cst_55 {dimension_numbers = #tpu.dot_dimension_numbers<[1], [0], [0], [1], [0, 0, 1, 1], [], []>} : vector<8x8xf32>, vector<8x32xf32>, vector<8x32xf32> -> vector<8x32xf32>
    %157 = vector.extract_strided_slice %99 {offsets = [7, 0, 0], sizes = [1, 32, 64], strides = [1, 1, 1]} : vector<8x32x64xf32> to vector<1x32x64xf32>
    %158 = vector.shape_cast %157 : vector<1x32x64xf32> to vector<32x64xf32>
    %cst_56 = arith.constant dense<0.000000e+00> : vector<8x64xf32>
    %159 = tpu.matmul %156, %158, %cst_56 {dimension_numbers = #tpu.dot_dimension_numbers<[1], [0], [0], [1], [0, 0, 1, 1], [], []>} : vector<8x32xf32>, vector<32x64xf32>, vector<8x64xf32> -> vector<8x64xf32>
    %160 = arith.addf %153, %159 : vector<8x64xf32>
    %cst_57 = arith.constant 0.000000e+00 : f32
    %161 = vector.broadcast %cst_57 : f32 to vector<8x64xf32>
    %162 = arith.cmpf ogt, %160, %161 : vector<8x64xf32>
    %cst_58 = arith.constant 0.000000e+00 : f32
    %163 = vector.broadcast %cst_58 : f32 to vector<8x64xf32>
    %164 = arith.minimumf %160, %163 : vector<8x64xf32>
    %165 = math.exp %164 : vector<8x64xf32>
    %cst_59 = arith.constant 1.000000e+00 : f32
    %166 = vector.broadcast %cst_59 : f32 to vector<8x64xf32>
    %167 = arith.subf %165, %166 : vector<8x64xf32>
    %168 = arith.select %162, %160, %167 : vector<8x64xi1>, vector<8x64xf32>
    %c0_60 = arith.constant 0 : index
    %c0_61 = arith.constant 0 : index
    %169 = vector.load %arg7[%c0_60, %c0_61] : memref<4x8xf32, #tpu.memory_space<vmem>>, vector<4x8xf32>
    %cst_62 = arith.constant dense<0.000000e+00> : vector<4x64xf32>
    %170 = tpu.matmul %169, %168, %cst_62 {dimension_numbers = #tpu.dot_dimension_numbers<[1], [0], [0], [1], [0, 0, 1, 1], [], []>} : vector<4x8xf32>, vector<8x64xf32>, vector<4x64xf32> -> vector<4x64xf32>
    %c0_63 = arith.constant 0 : index
    %c0_64 = arith.constant 0 : index
    %171 = vector.load %arg8[%c0_63, %c0_64] : memref<4x8xf32, #tpu.memory_space<vmem>>, vector<4x8xf32>
    %cst_65 = arith.constant dense<0.000000e+00> : vector<4x64xf32>
    %172 = tpu.matmul %171, %168, %cst_65 {dimension_numbers = #tpu.dot_dimension_numbers<[1], [0], [0], [1], [0, 0, 1, 1], [], []>} : vector<4x8xf32>, vector<8x64xf32>, vector<4x64xf32> -> vector<4x64xf32>
    %173 = arith.maximumf %170, %172 : vector<4x64xf32>
    %c0_66 = arith.constant 0 : index
    %c0_67 = arith.constant 0 : index
    %c0_68 = arith.constant 0 : index
    %c0_69 = arith.constant 0 : index
    %174 = vector.load %arg4[%c0_66, %c0_67, %c0_68, %c0_69] : memref<1x8x4x4xf32, #tpu.memory_space<vmem>>, vector<1x8x4x4xf32>
    %175 = vector.shape_cast %174 : vector<1x8x4x4xf32> to vector<8x4x4xf32>
    %c0_70 = arith.constant 0 : index
    %c0_71 = arith.constant 0 : index
    %c0_72 = arith.constant 0 : index
    %176 = vector.load %arg15[%c0_70, %c0_71, %c0_72] : memref<8x64x64xf32, #tpu.memory_space<vmem>>, vector<8x64x64xf32>
    %c0_73 = arith.constant 0 : index
    %c0_74 = arith.constant 0 : index
    %177 = vector.load %arg16[%c0_73, %c0_74] : memref<64x64xf32, #tpu.memory_space<vmem>>, vector<64x64xf32>
    %cst_75 = arith.constant dense<0.000000e+00> : vector<4x64xf32>
    %178 = tpu.matmul %173, %177, %cst_75 {dimension_numbers = #tpu.dot_dimension_numbers<[1], [0], [0], [1], [0, 0, 1, 1], [], []>} : vector<4x64xf32>, vector<64x64xf32>, vector<4x64xf32> -> vector<4x64xf32>
    %c0_76 = arith.constant 0 : index
    %c0_77 = arith.constant 0 : index
    %179 = vector.load %arg17[%c0_76, %c0_77] : memref<1x64xf32, #tpu.memory_space<vmem>>, vector<1x64xf32>
    %180 = vector.broadcast %179 : vector<1x64xf32> to vector<4x64xf32>
    %181 = arith.addf %178, %180 : vector<4x64xf32>
    %182 = vector.extract_strided_slice %175 {offsets = [0, 0, 0], sizes = [1, 4, 4], strides = [1, 1, 1]} : vector<8x4x4xf32> to vector<1x4x4xf32>
    %183 = vector.shape_cast %182 : vector<1x4x4xf32> to vector<4x4xf32>
    %cst_78 = arith.constant dense<0.000000e+00> : vector<4x64xf32>
    %184 = tpu.matmul %183, %173, %cst_78 {dimension_numbers = #tpu.dot_dimension_numbers<[1], [0], [0], [1], [0, 0, 1, 1], [], []>} : vector<4x4xf32>, vector<4x64xf32>, vector<4x64xf32> -> vector<4x64xf32>
    %185 = vector.extract_strided_slice %176 {offsets = [0, 0, 0], sizes = [1, 64, 64], strides = [1, 1, 1]} : vector<8x64x64xf32> to vector<1x64x64xf32>
    %186 = vector.shape_cast %185 : vector<1x64x64xf32> to vector<64x64xf32>
    %cst_79 = arith.constant dense<0.000000e+00> : vector<4x64xf32>
    %187 = tpu.matmul %184, %186, %cst_79 {dimension_numbers = #tpu.dot_dimension_numbers<[1], [0], [0], [1], [0, 0, 1, 1], [], []>} : vector<4x64xf32>, vector<64x64xf32>, vector<4x64xf32> -> vector<4x64xf32>
    %188 = arith.addf %181, %187 : vector<4x64xf32>
    %189 = vector.extract_strided_slice %175 {offsets = [1, 0, 0], sizes = [1, 4, 4], strides = [1, 1, 1]} : vector<8x4x4xf32> to vector<1x4x4xf32>
    %190 = vector.shape_cast %189 : vector<1x4x4xf32> to vector<4x4xf32>
    %cst_80 = arith.constant dense<0.000000e+00> : vector<4x64xf32>
    %191 = tpu.matmul %190, %173, %cst_80 {dimension_numbers = #tpu.dot_dimension_numbers<[1], [0], [0], [1], [0, 0, 1, 1], [], []>} : vector<4x4xf32>, vector<4x64xf32>, vector<4x64xf32> -> vector<4x64xf32>
    %192 = vector.extract_strided_slice %176 {offsets = [1, 0, 0], sizes = [1, 64, 64], strides = [1, 1, 1]} : vector<8x64x64xf32> to vector<1x64x64xf32>
    %193 = vector.shape_cast %192 : vector<1x64x64xf32> to vector<64x64xf32>
    %cst_81 = arith.constant dense<0.000000e+00> : vector<4x64xf32>
    %194 = tpu.matmul %191, %193, %cst_81 {dimension_numbers = #tpu.dot_dimension_numbers<[1], [0], [0], [1], [0, 0, 1, 1], [], []>} : vector<4x64xf32>, vector<64x64xf32>, vector<4x64xf32> -> vector<4x64xf32>
    %195 = arith.addf %188, %194 : vector<4x64xf32>
    %196 = vector.extract_strided_slice %175 {offsets = [2, 0, 0], sizes = [1, 4, 4], strides = [1, 1, 1]} : vector<8x4x4xf32> to vector<1x4x4xf32>
    %197 = vector.shape_cast %196 : vector<1x4x4xf32> to vector<4x4xf32>
    %cst_82 = arith.constant dense<0.000000e+00> : vector<4x64xf32>
    %198 = tpu.matmul %197, %173, %cst_82 {dimension_numbers = #tpu.dot_dimension_numbers<[1], [0], [0], [1], [0, 0, 1, 1], [], []>} : vector<4x4xf32>, vector<4x64xf32>, vector<4x64xf32> -> vector<4x64xf32>
    %199 = vector.extract_strided_slice %176 {offsets = [2, 0, 0], sizes = [1, 64, 64], strides = [1, 1, 1]} : vector<8x64x64xf32> to vector<1x64x64xf32>
    %200 = vector.shape_cast %199 : vector<1x64x64xf32> to vector<64x64xf32>
    %cst_83 = arith.constant dense<0.000000e+00> : vector<4x64xf32>
    %201 = tpu.matmul %198, %200, %cst_83 {dimension_numbers = #tpu.dot_dimension_numbers<[1], [0], [0], [1], [0, 0, 1, 1], [], []>} : vector<4x64xf32>, vector<64x64xf32>, vector<4x64xf32> -> vector<4x64xf32>
    %202 = arith.addf %195, %201 : vector<4x64xf32>
    %203 = vector.extract_strided_slice %175 {offsets = [3, 0, 0], sizes = [1, 4, 4], strides = [1, 1, 1]} : vector<8x4x4xf32> to vector<1x4x4xf32>
    %204 = vector.shape_cast %203 : vector<1x4x4xf32> to vector<4x4xf32>
    %cst_84 = arith.constant dense<0.000000e+00> : vector<4x64xf32>
    %205 = tpu.matmul %204, %173, %cst_84 {dimension_numbers = #tpu.dot_dimension_numbers<[1], [0], [0], [1], [0, 0, 1, 1], [], []>} : vector<4x4xf32>, vector<4x64xf32>, vector<4x64xf32> -> vector<4x64xf32>
    %206 = vector.extract_strided_slice %176 {offsets = [3, 0, 0], sizes = [1, 64, 64], strides = [1, 1, 1]} : vector<8x64x64xf32> to vector<1x64x64xf32>
    %207 = vector.shape_cast %206 : vector<1x64x64xf32> to vector<64x64xf32>
    %cst_85 = arith.constant dense<0.000000e+00> : vector<4x64xf32>
    %208 = tpu.matmul %205, %207, %cst_85 {dimension_numbers = #tpu.dot_dimension_numbers<[1], [0], [0], [1], [0, 0, 1, 1], [], []>} : vector<4x64xf32>, vector<64x64xf32>, vector<4x64xf32> -> vector<4x64xf32>
    %209 = arith.addf %202, %208 : vector<4x64xf32>
    %210 = vector.extract_strided_slice %175 {offsets = [4, 0, 0], sizes = [1, 4, 4], strides = [1, 1, 1]} : vector<8x4x4xf32> to vector<1x4x4xf32>
    %211 = vector.shape_cast %210 : vector<1x4x4xf32> to vector<4x4xf32>
    %cst_86 = arith.constant dense<0.000000e+00> : vector<4x64xf32>
    %212 = tpu.matmul %211, %173, %cst_86 {dimension_numbers = #tpu.dot_dimension_numbers<[1], [0], [0], [1], [0, 0, 1, 1], [], []>} : vector<4x4xf32>, vector<4x64xf32>, vector<4x64xf32> -> vector<4x64xf32>
    %213 = vector.extract_strided_slice %176 {offsets = [4, 0, 0], sizes = [1, 64, 64], strides = [1, 1, 1]} : vector<8x64x64xf32> to vector<1x64x64xf32>
    %214 = vector.shape_cast %213 : vector<1x64x64xf32> to vector<64x64xf32>
    %cst_87 = arith.constant dense<0.000000e+00> : vector<4x64xf32>
    %215 = tpu.matmul %212, %214, %cst_87 {dimension_numbers = #tpu.dot_dimension_numbers<[1], [0], [0], [1], [0, 0, 1, 1], [], []>} : vector<4x64xf32>, vector<64x64xf32>, vector<4x64xf32> -> vector<4x64xf32>
    %216 = arith.addf %209, %215 : vector<4x64xf32>
    %217 = vector.extract_strided_slice %175 {offsets = [5, 0, 0], sizes = [1, 4, 4], strides = [1, 1, 1]} : vector<8x4x4xf32> to vector<1x4x4xf32>
    %218 = vector.shape_cast %217 : vector<1x4x4xf32> to vector<4x4xf32>
    %cst_88 = arith.constant dense<0.000000e+00> : vector<4x64xf32>
    %219 = tpu.matmul %218, %173, %cst_88 {dimension_numbers = #tpu.dot_dimension_numbers<[1], [0], [0], [1], [0, 0, 1, 1], [], []>} : vector<4x4xf32>, vector<4x64xf32>, vector<4x64xf32> -> vector<4x64xf32>
    %220 = vector.extract_strided_slice %176 {offsets = [5, 0, 0], sizes = [1, 64, 64], strides = [1, 1, 1]} : vector<8x64x64xf32> to vector<1x64x64xf32>
    %221 = vector.shape_cast %220 : vector<1x64x64xf32> to vector<64x64xf32>
    %cst_89 = arith.constant dense<0.000000e+00> : vector<4x64xf32>
    %222 = tpu.matmul %219, %221, %cst_89 {dimension_numbers = #tpu.dot_dimension_numbers<[1], [0], [0], [1], [0, 0, 1, 1], [], []>} : vector<4x64xf32>, vector<64x64xf32>, vector<4x64xf32> -> vector<4x64xf32>
    %223 = arith.addf %216, %222 : vector<4x64xf32>
    %224 = vector.extract_strided_slice %175 {offsets = [6, 0, 0], sizes = [1, 4, 4], strides = [1, 1, 1]} : vector<8x4x4xf32> to vector<1x4x4xf32>
    %225 = vector.shape_cast %224 : vector<1x4x4xf32> to vector<4x4xf32>
    %cst_90 = arith.constant dense<0.000000e+00> : vector<4x64xf32>
    %226 = tpu.matmul %225, %173, %cst_90 {dimension_numbers = #tpu.dot_dimension_numbers<[1], [0], [0], [1], [0, 0, 1, 1], [], []>} : vector<4x4xf32>, vector<4x64xf32>, vector<4x64xf32> -> vector<4x64xf32>
    %227 = vector.extract_strided_slice %176 {offsets = [6, 0, 0], sizes = [1, 64, 64], strides = [1, 1, 1]} : vector<8x64x64xf32> to vector<1x64x64xf32>
    %228 = vector.shape_cast %227 : vector<1x64x64xf32> to vector<64x64xf32>
    %cst_91 = arith.constant dense<0.000000e+00> : vector<4x64xf32>
    %229 = tpu.matmul %226, %228, %cst_91 {dimension_numbers = #tpu.dot_dimension_numbers<[1], [0], [0], [1], [0, 0, 1, 1], [], []>} : vector<4x64xf32>, vector<64x64xf32>, vector<4x64xf32> -> vector<4x64xf32>
    %230 = arith.addf %223, %229 : vector<4x64xf32>
    %231 = vector.extract_strided_slice %175 {offsets = [7, 0, 0], sizes = [1, 4, 4], strides = [1, 1, 1]} : vector<8x4x4xf32> to vector<1x4x4xf32>
    %232 = vector.shape_cast %231 : vector<1x4x4xf32> to vector<4x4xf32>
    %cst_92 = arith.constant dense<0.000000e+00> : vector<4x64xf32>
    %233 = tpu.matmul %232, %173, %cst_92 {dimension_numbers = #tpu.dot_dimension_numbers<[1], [0], [0], [1], [0, 0, 1, 1], [], []>} : vector<4x4xf32>, vector<4x64xf32>, vector<4x64xf32> -> vector<4x64xf32>
    %234 = vector.extract_strided_slice %176 {offsets = [7, 0, 0], sizes = [1, 64, 64], strides = [1, 1, 1]} : vector<8x64x64xf32> to vector<1x64x64xf32>
    %235 = vector.shape_cast %234 : vector<1x64x64xf32> to vector<64x64xf32>
    %cst_93 = arith.constant dense<0.000000e+00> : vector<4x64xf32>
    %236 = tpu.matmul %233, %235, %cst_93 {dimension_numbers = #tpu.dot_dimension_numbers<[1], [0], [0], [1], [0, 0, 1, 1], [], []>} : vector<4x64xf32>, vector<64x64xf32>, vector<4x64xf32> -> vector<4x64xf32>
    %237 = arith.addf %230, %236 : vector<4x64xf32>
    %cst_94 = arith.constant 0.000000e+00 : f32
    %238 = vector.broadcast %cst_94 : f32 to vector<4x64xf32>
    %239 = arith.cmpf ogt, %237, %238 : vector<4x64xf32>
    %cst_95 = arith.constant 0.000000e+00 : f32
    %240 = vector.broadcast %cst_95 : f32 to vector<4x64xf32>
    %241 = arith.minimumf %237, %240 : vector<4x64xf32>
    %242 = math.exp %241 : vector<4x64xf32>
    %cst_96 = arith.constant 1.000000e+00 : f32
    %243 = vector.broadcast %cst_96 : f32 to vector<4x64xf32>
    %244 = arith.subf %242, %243 : vector<4x64xf32>
    %245 = arith.select %239, %237, %244 : vector<4x64xi1>, vector<4x64xf32>
    %c0_97 = arith.constant 0 : index
    %c0_98 = arith.constant 0 : index
    %246 = vector.load %arg18[%c0_97, %c0_98] : memref<64x128xf32, #tpu.memory_space<vmem>>, vector<64x128xf32>
    %cst_99 = arith.constant dense<0.000000e+00> : vector<4x128xf32>
    %247 = tpu.matmul %245, %246, %cst_99 {dimension_numbers = #tpu.dot_dimension_numbers<[1], [0], [0], [1], [0, 0, 1, 1], [], []>} : vector<4x64xf32>, vector<64x128xf32>, vector<4x128xf32> -> vector<4x128xf32>
    %c0_100 = arith.constant 0 : index
    %c0_101 = arith.constant 0 : index
    %248 = vector.load %arg19[%c0_100, %c0_101] : memref<1x128xf32, #tpu.memory_space<vmem>>, vector<1x128xf32>
    %249 = vector.broadcast %248 : vector<1x128xf32> to vector<4x128xf32>
    %250 = arith.addf %247, %249 : vector<4x128xf32>
    %cst_102 = arith.constant 0.000000e+00 : f32
    %251 = vector.broadcast %cst_102 : f32 to vector<4x128xf32>
    %252 = arith.cmpf ogt, %250, %251 : vector<4x128xf32>
    %cst_103 = arith.constant 0.000000e+00 : f32
    %253 = vector.broadcast %cst_103 : f32 to vector<4x128xf32>
    %254 = arith.minimumf %250, %253 : vector<4x128xf32>
    %255 = math.exp %254 : vector<4x128xf32>
    %cst_104 = arith.constant 1.000000e+00 : f32
    %256 = vector.broadcast %cst_104 : f32 to vector<4x128xf32>
    %257 = arith.subf %255, %256 : vector<4x128xf32>
    %258 = arith.select %252, %250, %257 : vector<4x128xi1>, vector<4x128xf32>
    %c0_105 = arith.constant 0 : index
    %c0_106 = arith.constant 0 : index
    %259 = vector.load %arg20[%c0_105, %c0_106] : memref<128x1xf32, #tpu.memory_space<vmem>>, vector<128x1xf32>
    %cst_107 = arith.constant dense<0.000000e+00> : vector<4x1xf32>
    %260 = tpu.matmul %258, %259, %cst_107 {dimension_numbers = #tpu.dot_dimension_numbers<[1], [0], [0], [1], [0, 0, 1, 1], [], []>} : vector<4x128xf32>, vector<128x1xf32>, vector<4x1xf32> -> vector<4x1xf32>
    %c0_108 = arith.constant 0 : index
    %c0_109 = arith.constant 0 : index
    %261 = vector.load %arg21[%c0_108, %c0_109] : memref<1x1xf32, #tpu.memory_space<vmem>>, vector<1x1xf32>
    %262 = vector.broadcast %261 : vector<1x1xf32> to vector<4x1xf32>
    %263 = arith.addf %260, %262 : vector<4x1xf32>
    %cst_110 = arith.constant dense<0.000000e+00> : vector<1xf32>
    %264 = vector.multi_reduction <add>, %263, %cst_110 [0] : vector<4x1xf32> to vector<1xf32>
    %265 = vector.shape_cast %264 : vector<1xf32> to vector<1x1xf32>
    %cst_111 = arith.constant 2.500000e-01 : f32
    %266 = vector.broadcast %cst_111 : f32 to vector<1x1xf32>
    %267 = arith.mulf %265, %266 : vector<1x1xf32>
    %268 = arith.negf %267 : vector<1x1xf32>
    %269 = math.exp %268 : vector<1x1xf32>
    %cst_112 = arith.constant 1.000000e+00 : f32
    %270 = vector.broadcast %cst_112 : f32 to vector<1x1xf32>
    %271 = arith.addf %270, %269 : vector<1x1xf32>
    %272 = arith.divf %270, %271 : vector<1x1xf32>
    %c0_113 = arith.constant 0 : index
    %c0_114 = arith.constant 0 : index
    %c0_115 = arith.constant 0 : index
    %273 = vector.load %arg22[%c0_113, %c0_114, %c0_115] : memref<1x1x1xf32, #tpu.memory_space<vmem>>, vector<1x1x1xf32>
    %274 = vector.shape_cast %273 : vector<1x1x1xf32> to vector<1x1xf32>
    %275 = vector.shape_cast %272 : vector<1x1xf32> to vector<1x1x1xf32>
    tpu.vector_store %arg22[%c0_113, %c0_114, %c0_115], %275 {strides = array<i32>} : memref<1x1x1xf32, #tpu.memory_space<vmem>>, vector<1x1x1xf32>,
    return
  }
  func.func @transform_0(%arg0: i32) -> (i32, i32, i32) {
    %c0_i32 = arith.constant 0 : i32
    %c0_i32_0 = arith.constant 0 : i32
    %c0_i32_1 = arith.constant 0 : i32
    return %arg0, %c0_i32, %c0_i32_0 : i32, i32, i32
  }
  func.func @transform_1(%arg0: i32) -> (i32, i32, i32, i32) {
    %c0_i32 = arith.constant 0 : i32
    %c0_i32_0 = arith.constant 0 : i32
    %c0_i32_1 = arith.constant 0 : i32
    %c0_i32_2 = arith.constant 0 : i32
    return %arg0, %c0_i32, %c0_i32_0, %c0_i32_1 : i32, i32, i32, i32
  }
  func.func @transform_2(%arg0: i32) -> (i32, i32, i32, i32) {
    %c0_i32 = arith.constant 0 : i32
    %c0_i32_0 = arith.constant 0 : i32
    %c0_i32_1 = arith.constant 0 : i32
    %c0_i32_2 = arith.constant 0 : i32
    return %arg0, %c0_i32, %c0_i32_0, %c0_i32_1 : i32, i32, i32, i32
  }
  func.func @transform_3(%arg0: i32) -> (i32, i32, i32, i32) {
    %c0_i32 = arith.constant 0 : i32
    %c0_i32_0 = arith.constant 0 : i32
    %c0_i32_1 = arith.constant 0 : i32
    %c0_i32_2 = arith.constant 0 : i32
    return %arg0, %c0_i32, %c0_i32_0, %c0_i32_1 : i32, i32, i32, i32
  }
  func.func @transform_4(%arg0: i32) -> (i32, i32) {
    %c0_i32 = arith.constant 0 : i32
    %c0_i32_0 = arith.constant 0 : i32
    %c0_i32_1 = arith.constant 0 : i32
    return %c0_i32, %c0_i32_0 : i32, i32
  }
  func.func @transform_5(%arg0: i32) -> (i32, i32) {
    %c0_i32 = arith.constant 0 : i32
    %c0_i32_0 = arith.constant 0 : i32
    %c0_i32_1 = arith.constant 0 : i32
    return %c0_i32, %c0_i32_0 : i32, i32
  }
  func.func @transform_6(%arg0: i32) -> (i32, i32) {
    %c0_i32 = arith.constant 0 : i32
    %c0_i32_0 = arith.constant 0 : i32
    %c0_i32_1 = arith.constant 0 : i32
    return %c0_i32, %c0_i32_0 : i32, i32
  }
  func.func @transform_7(%arg0: i32) -> (i32, i32) {
    %c0_i32 = arith.constant 0 : i32
    %c0_i32_0 = arith.constant 0 : i32
    %c0_i32_1 = arith.constant 0 : i32
    return %c0_i32, %c0_i32_0 : i32, i32
  }
  func.func @transform_8(%arg0: i32) -> (i32, i32, i32) {
    %c0_i32 = arith.constant 0 : i32
    %c0_i32_0 = arith.constant 0 : i32
    %c0_i32_1 = arith.constant 0 : i32
    %c0_i32_2 = arith.constant 0 : i32
    return %c0_i32, %c0_i32_0, %c0_i32_1 : i32, i32, i32
  }
  func.func @transform_9(%arg0: i32) -> (i32, i32) {
    %c0_i32 = arith.constant 0 : i32
    %c0_i32_0 = arith.constant 0 : i32
    %c0_i32_1 = arith.constant 0 : i32
    return %c0_i32, %c0_i32_0 : i32, i32
  }
  func.func @transform_10(%arg0: i32) -> (i32, i32) {
    %c0_i32 = arith.constant 0 : i32
    %c0_i32_0 = arith.constant 0 : i32
    %c0_i32_1 = arith.constant 0 : i32
    return %c0_i32, %c0_i32_0 : i32, i32
  }
  func.func @transform_11(%arg0: i32) -> (i32, i32, i32) {
    %c0_i32 = arith.constant 0 : i32
    %c0_i32_0 = arith.constant 0 : i32
    %c0_i32_1 = arith.constant 0 : i32
    %c0_i32_2 = arith.constant 0 : i32
    return %c0_i32, %c0_i32_0, %c0_i32_1 : i32, i32, i32
  }
  func.func @transform_12(%arg0: i32) -> (i32, i32) {
    %c0_i32 = arith.constant 0 : i32
    %c0_i32_0 = arith.constant 0 : i32
    %c0_i32_1 = arith.constant 0 : i32
    return %c0_i32, %c0_i32_0 : i32, i32
  }
  func.func @transform_13(%arg0: i32) -> (i32, i32) {
    %c0_i32 = arith.constant 0 : i32
    %c0_i32_0 = arith.constant 0 : i32
    %c0_i32_1 = arith.constant 0 : i32
    return %c0_i32, %c0_i32_0 : i32, i32
  }
  func.func @transform_14(%arg0: i32) -> (i32, i32, i32) {
    %c0_i32 = arith.constant 0 : i32
    %c0_i32_0 = arith.constant 0 : i32
    %c0_i32_1 = arith.constant 0 : i32
    %c0_i32_2 = arith.constant 0 : i32
    return %c0_i32, %c0_i32_0, %c0_i32_1 : i32, i32, i32
  }
  func.func @transform_15(%arg0: i32) -> (i32, i32) {
    %c0_i32 = arith.constant 0 : i32
    %c0_i32_0 = arith.constant 0 : i32
    %c0_i32_1 = arith.constant 0 : i32
    return %c0_i32, %c0_i32_0 : i32, i32
  }
  func.func @transform_16(%arg0: i32) -> (i32, i32) {
    %c0_i32 = arith.constant 0 : i32
    %c0_i32_0 = arith.constant 0 : i32
    %c0_i32_1 = arith.constant 0 : i32
    return %c0_i32, %c0_i32_0 : i32, i32
  }
  func.func @transform_17(%arg0: i32) -> (i32, i32) {
    %c0_i32 = arith.constant 0 : i32
    %c0_i32_0 = arith.constant 0 : i32
    %c0_i32_1 = arith.constant 0 : i32
    return %c0_i32, %c0_i32_0 : i32, i32
  }
  func.func @transform_18(%arg0: i32) -> (i32, i32) {
    %c0_i32 = arith.constant 0 : i32
    %c0_i32_0 = arith.constant 0 : i32
    %c0_i32_1 = arith.constant 0 : i32
    return %c0_i32, %c0_i32_0 : i32, i32
  }
  func.func @transform_19(%arg0: i32) -> (i32, i32) {
    %c0_i32 = arith.constant 0 : i32
    %c0_i32_0 = arith.constant 0 : i32
    %c0_i32_1 = arith.constant 0 : i32
    return %c0_i32, %c0_i32_0 : i32, i32
  }
  func.func @transform_20(%arg0: i32) -> (i32, i32) {
    %c0_i32 = arith.constant 0 : i32
    %c0_i32_0 = arith.constant 0 : i32
    %c0_i32_1 = arith.constant 0 : i32
    return %c0_i32, %c0_i32_0 : i32, i32
  }
  func.func @transform_21(%arg0: i32) -> (i32, i32, i32) {
    %c0_i32 = arith.constant 0 : i32
    %c0_i32_0 = arith.constant 0 : i32
    %c0_i32_1 = arith.constant 0 : i32
    return %arg0, %c0_i32, %c0_i32_0 : i32, i32, i32
  }
}

</mosaic_0001>

<bundles_post_ra>
// kernel: tpu_custom_call.1
= control target key start
LH: loop header
LB: loop body
LE: loop exit
PB: predicated region body
PF: predicated region fallthrough
CT: control target
= control target key end

     0   :  { %s3612_s0 = inlined_call_operand.vmem [shape: f32[2,16,1], index: 0, kind: input, shape index: {}]   ;;  %s3613_s1 = inlined_call_operand.hbm [shape: f32[2,8,16,16], index: 1, kind: input, shape index: {}]   ;;  %s3614_s2 = inlined_call_operand.vmem [shape: f32[2,8,8,8], index: 2, kind: input, shape index: {}]   ;;  %s3615_s3 = inlined_call_operand.vmem [shape: f32[2,8,4,4], index: 3, kind: input, shape index: {}]   ;;  %s3616_s4 = inlined_call_operand.hbm [shape: f32[8,16], index: 4, kind: input, shape index: {}]   ;;  %s3617_s5 = inlined_call_operand.hbm [shape: f32[8,16], index: 5, kind: input, shape index: {}]   ;;  %s3618_s6 = inlined_call_operand.hbm [shape: f32[4,8], index: 6, kind: input, shape index: {}]   ;;  %s3619_s7 = inlined_call_operand.hbm [shape: f32[4,8], index: 7, kind: input, shape index: {}]   ;;  %s3620_s8 = inlined_call_operand.vmem [shape: f32[8,1,32], index: 8, kind: input, shape index: {}]   ;;  %s3621_s9 = inlined_call_operand.vmem [shape: f32[1,32], index: 9, kind: input, shape index: {}]   ;;  %s3622_s10 = inlined_call_operand.vmem [shape: f32[1,32], index: 10, kind: input, shape index: {}]   ;;  %s3623_s11 = inlined_call_operand.hbm [shape: f32[8,32,64], index: 11, kind: input, shape index: {}]   ;;  %s3624_s12 = inlined_call_operand.vmem [shape: f32[32,64], index: 12, kind: input, shape index: {}]   ;;  %s3625_s13 = inlined_call_operand.vmem [shape: f32[1,64], index: 13, kind: input, shape index: {}]   ;;  %s3626_s14 = inlined_call_operand.hbm [shape: f32[8,64,64], index: 14, kind: input, shape index: {}]   ;;  %s3627_s15 = inlined_call_operand.vmem [shape: f32[64,64], index: 15, kind: input, shape index: {}]   ;;  %s3628_s16 = inlined_call_operand.vmem [shape: f32[1,64], index: 16, kind: input, shape index: {}]   ;;  %s3629_s17 = inlined_call_operand.hbm [shape: f32[64,128], index: 17, kind: input, shape index: {}]   ;;  %s3630_s18 = inlined_call_operand.vmem [shape: f32[1,128], index: 18, kind: input, shape index: {}]   ;;  %s3631_s19 = inlined_call_operand.vmem [shape: f32[128,1], index: 19, kind: input, shape index: {}]   ;;  %s3632_s20 = inlined_call_operand.<no memory space> [shape: f32[1,1], index: 20, kind: input, shape index: {}]   ;;  %s3633_s21 = inlined_call_operand.vmem [shape: f32[2,1,1], index: 21, kind: output, shape index: {}]  }
   0x1   :  { %3639 = sst [smem:[#allocation21_spill]] %s3612_s0  ;;  %v26_v0 = vstv %s3632_s20 }
   0x2   :  { %3640 = sst [smem:[#allocation22_spill]] %s3613_s1  ;;  %27 = vst [vmem:[#allocation2] sm:$0x1] %v26_v0 }
   0x3   :  { %3641 = sst [smem:[#allocation23_spill]] %s3614_s2 }
   0x4   :  { %3642 = sst [smem:[#allocation24_spill]] %s3615_s3 }
   0x5   :  { %3643 = sst [smem:[#allocation25_spill]] %s3616_s4 }
   0x6   :  { %3644 = sst [smem:[#allocation26_spill]] %s3617_s5 }
   0x7   :  { %3645 = sst [smem:[#allocation27_spill]] %s3618_s6 }
   0x8   :  { %3646 = sst [smem:[#allocation28_spill]] %s3627_s15 }
   0x9   :  { %3647 = sst [smem:[#allocation29_spill]] %s3628_s16 }
   0xa   :  { %3648 = sst [smem:[#allocation30_spill]] %s3630_s18 }
   0xb   :  { %3649 = sst [smem:[#allocation31_spill]] %s3631_s19 }
   0xc   :  { %3650 = sst [smem:[#allocation32_spill]] %s3633_s21 }
   0xd   :  { %28 = vsyncpa [#allocation4], 0 }
   0xe   :  { %30 = vsyncpa [#allocation4 + $0x1], 0 }
   0xf   :  { %31 = vsyncpa [#allocation6], 0 }
  0x10   :  { %32 = vsyncpa [#allocation9], 0 }
  0x11   :  { %33 = vsyncpa [#allocation12], 0 }
  0x12   :  { %34 = vsyncpa [#allocation15], 0  ;;  %s3174_s26 = smov 0   ;;  %s3176_s27 = smov 0  }
  0x13   :  { %s3178_s3 = smov 0   ;;  %s3180_s28 = smov 0  }
  0x14 LB: > { %s3651_s0 = sld [smem:[#allocation25_spill]]  ;;  %s3198_s30 = sadd.s32 4294967295, %s3049_s28   ;;  %s3049_s28 = sphi %s3180_s28, %s3672_s28   ;;  %s3045_s3 = sphi %s3178_s3, %s3671_s3   ;;  %s3041_s27 = sphi %s3176_s27, %s3670_s27   ;;  %s3037_s26 = sphi %s3174_s26, %s3669_s26  }
  0x15   : > { %p2515_p0 = scmp.ge.s32.totalorder %s3049_s28, 1  ;;  %p87_p1 = scmp.eq.s32.totalorder %s3198_s30, 0 }
  0x16   : > { %p532_p2 = scmp.lt.s32.totalorder %s3049_s28, 3  ;;  %s3051_s22 = smov [#allocation5]  }
  0x17   : > { %s546_s23 = sshll.u32 %s3051_s22, 4  ;;  %s3653_s6 = sld [smem:[#allocation27_spill]]  ;;  %s547_s23 = int_to_ptr.vmem [resolvable:$true] %s546_s23 }
  0x18   : > { %p3203_p3 = pnand %p2515_p0, %p532_p2  ;;  %s3052_s20 = smov [#allocation8]  }
  0x19   : > { %s570_s29 = sshll.u32 %s3052_s20, 4  ;;  %s600_s21 = sshll.u32 %s3623_s11, 4  ;;  %s571_s29 = int_to_ptr.vmem [resolvable:$true] %s570_s29  ;;  %s601_s21 = int_to_ptr.hbm [resolvable:$true] %s600_s21 }
  0x1a   : > { %s544_s4 = sshll.u32 %s3651_s0, 4  ;;  %p2647_p4 = pneg %p3203_p3  ;;  %s545_s4 = int_to_ptr.hbm [resolvable:$true] %s544_s4 }
  0x1b   : > { %s3053_s1 = smov [#allocation11]   ;;  %s3655_s19 = sld [smem:[#allocation26_spill]] }
  0x1c   : > { %p3214_p5 = pnand %p2647_p4, %p87_p1  ;;  %s602_s24 = sshll.u32 %s3053_s1, 4  ;;  %s603_s24 = int_to_ptr.vmem [resolvable:$true] %s602_s24 }
  0x1d   : > { %s568_s2 = sshll.u32 %s3653_s6, 4  ;;  %s3637_s20 = smov 128   ;;  %s569_s2 = int_to_ptr.hbm [resolvable:$true] %s568_s2 }
  0x1e   : > { %2650 = dma.hbm_to_vmem [thread:$0]  (!%p3214_p5), %s545_s4, 128, %s547_s23, [#allocation6]  }
  0x1f   : > { %2656 = dma.hbm_to_vmem [thread:$0]  (!%p3214_p5), %s569_s2, 64, %s571_s29, [#allocation9]  }
  0x20   : > { %s3638_s15 = smov 8   ;;  %s3056_s0 = smov [#allocation7]  }
  0x21   : > { %s556_s16 = sshll.u32 %s3655_s19, 4  ;;  %s558_s4 = sshll.u32 %s3056_s0, 4  ;;  %s557_s16 = int_to_ptr.hbm [resolvable:$true] %s556_s16  ;;  %s559_s4 = int_to_ptr.vmem [resolvable:$true] %s558_s4 }
  0x22   : > { %2662 = dma.hbm_to_vmem [thread:$0]  (!%p3214_p5), %s601_s21, 4096, %s603_s24, [#allocation12], %s3637_s20, %s3637_s20, %s3638_s15  }
  0x23   : > { %s580_s29 = sshll.u32 %s3619_s7, 4  ;;  %s620_s19 = sshll.u32 %s3626_s14, 4  ;;  %s581_s29 = int_to_ptr.hbm [resolvable:$true] %s580_s29  ;;  %s621_s19 = int_to_ptr.hbm [resolvable:$true] %s620_s19 }
  0x24   : > { %2653 = dma.hbm_to_vmem [thread:$0]  (!%p3214_p5), %s557_s16, 128, %s559_s4, [#allocation6]  }
  0x25   : > { %s3057_s22 = smov [#allocation10]   ;;  %s3058_s1 = smov [#allocation13]  }
  0x26   : > { %s582_s21 = sshll.u32 %s3057_s22, 4  ;;  %s622_s16 = sshll.u32 %s3058_s1, 4  ;;  %s583_s21 = int_to_ptr.vmem [resolvable:$true] %s582_s21  ;;  %s623_s16 = int_to_ptr.vmem [resolvable:$true] %s622_s16 }
  0x27   : > { %2659 = dma.hbm_to_vmem [thread:$0]  (!%p3214_p5), %s581_s29, 64, %s583_s21, [#allocation9]  }
  0x28   : > { %s640_s4 = sshll.u32 %s3629_s17, 4  ;;  %s3059_s23 = smov [#allocation14]   ;;  %s641_s4 = int_to_ptr.hbm [resolvable:$true] %s640_s4 }
  0x29   : > { %2665 = dma.hbm_to_vmem [thread:$0]  (!%p3214_p5), %s621_s19, 8192, %s623_s16, [#allocation12], %s3637_s20, %s3637_s20, %s3638_s15  }
  0x2a   : > { %s642_s2 = sshll.u32 %s3059_s23, 4  ;;  %s3257_s29 = sadd.s32 1, %s3049_s28   ;;  %s643_s2 = int_to_ptr.vmem [resolvable:$true] %s642_s2 }
  0x2b   : > { %2668 = dma.hbm_to_vmem [thread:$0]  (!%p3214_p5), %s641_s4, 1024, %s643_s2, [#allocation15], %s3637_s20, %s3637_s20, %s3638_s15  }
  0x2c   : > { %s70_s6 = ssub.s32 %s3049_s28, %s3257_s29  ;;  %s73_s18 = sadd.s32 1, %s3045_s3 }
  0x2d   : > { %p71_p6 = scmp.eq.s32.totalorder %s70_s6, 0  ;;  %p80_p7 = scmp.ne.s32.totalorder %s3045_s3, %s3041_s27 }
  0x2e   : > { %p81_p8 = scmp.eq.s32.totalorder %s3049_s28, 0  ;;  %p86_p9 = scmp.ne.s32.totalorder %s3041_s27, %s3037_s26 }
  0x2f   : > { %s3268_s19 = scalar_select %p71_p6, %s3045_s3, %s73_s18  }
  0x30   : > { %p82_p10 = por %p81_p8, %p80_p7  ;;  %p3272_p11 = por %p87_p1, %p86_p9 }
  0x31   : > { %p2680_p12 = scmp.lt.s32.totalorder %s3049_s28, 2  ;;  %s673_s25 = sand.u32 1, %s3045_s3  }
  0x32   : > { %s2524_s21 = sshll.u32 %s673_s25, 7  ;;  %s2613_s1 = sshll.u32 %s3049_s28, 7 }
  0x33   : > { %s3657_s0 = sld [smem:[#allocation22_spill]]  ;;  %s677_s23 = scalar_lea.vmem [#allocation3], %s2524_s21 }
  0x34   : > { %s685_s2 = sshll.u32 %s677_s23, 4  ;;  %p3282_p13 = pnand %p2680_p12, %p82_p10  ;;  %s686_s2 = int_to_ptr.vmem [resolvable:$true] %s685_s2 }
  0x35   : > { %s674_s18 = scalar_lea.sflag [#allocation4], %s673_s25 }
  0x36   : > { %p2973_p2 = pneg %p3282_p13 }
  0x39   : > { %s682_s4 = scalar_lea.hbm %s3657_s0, %s2613_s1  ;;  %s2976_s1 = scalar_lea.hbm %s3657_s0, 256 }
  0x3a   : > { %s683_s6 = sshll.u32 %s682_s4, 4  ;;  %s684_s6 = int_to_ptr.hbm [resolvable:$true] %s683_s6 }
  0x3b   : > { %s2969_s20 = sshra.s32 %s684_s6, 4  ;;  %s2970_s20 = int_to_ptr.hbm [resolvable:$true] %s2969_s20 }
  0x3c   : > { %s2971_s15 = scalar_lea.hbm %s2970_s20, 128  ;;  %p2977_p6 = scmp.lt.s32.totalorder %s2970_s20, %s3657_s0 }
  0x3d   : > { %p2972_p0 = scmp.ne.s32.totalorder %s2970_s20, %s2971_s15  ;;  %p2978_p7 = scmp.lt.s32.totalorder %s2976_s1, %s2971_s15 }
  0x3f   : > { %p2974_p4 = pnand %p2973_p2, %p2972_p0  ;;  %p2979_p8 = por %p2978_p7, %p2977_p6 }
  0x41   : > { %p2975_p5 = pneg %p2974_p4 }
  0x43   : > { %p2980_p9 = pnand %p2979_p8, %p2975_p5 }
  0x45   : > { %2983 = shalt.err (!%p2980_p9)
}
  0x46   : > { %s3659_s25 = smov 8   ;;  %s3660_s4 = smov 128  }
  0x47   : > { %2672 = dma.hbm_to_vmem [thread:$0]  (!%p3282_p13), %s684_s6, 2048, %s686_s2, %s674_s18, %s3660_s4, %s3660_s4, %s3659_s25  }
  0x48   : > { %713 = sbr.rel (%p3203_p3) target bundleno = 1851 (0x73b), region = 104  ;;  %s715_s23 = sand.u32 (!%p3203_p3), 1, %s3041_s27  }
  0x49   : > { %s2528_s28 = sshll.u32 (!%p3203_p3), %s715_s23, 7  ;;  %s716_s21 = scalar_lea.sflag (!%p3203_p3), [#allocation4], %s715_s23 }
  0x4a   : > { %s3302_s16 = scalar_lea.vmem (!%p3203_p3), [#allocation3], %s2528_s28 }
  0x4d   : > { %3016 = dma.done.wait (%p3272_p11), %s716_s21, 2048  }
  0x4e   : > { %3018 = vsyncadd (%p3272_p11), %s716_s21, 4294965248 }
  0x4f   : > { %3020 = dma.done.wait (%p87_p1), [#allocation6], 256  }
  0x50   : > { %3022 = vsyncadd (%p87_p1), [#allocation6], 4294967040 }
  0x51   : > { %3024 = dma.done.wait (%p87_p1), [#allocation9], 128  }
  0x52   : > { %3026 = vsyncadd (%p87_p1), [#allocation9], 4294967168 }
  0x53   : > { %3028 = dma.done.wait (%p87_p1), [#allocation12], 12288  }
  0x54   : > { %3030 = vsyncadd (%p87_p1), [#allocation12], 4294955008 }
  0x55   : > { %3032 = dma.done.wait (%p87_p1), [#allocation15], 1024  }
  0x56   : > { %3034 = vsyncadd (%p87_p1), [#allocation15], 4294966272  ;;  %p827_p3 = scmp.lt.s32.totalorder %s3198_s30, 1  ;;  %v3060_v1 = vmov 0   ;;  %s3661_s22 = sld [smem:[#allocation21_spill]]  ;;  %v847_v21 = vld [vmem:[%s3302_s16] sm:$0xff] }
  0x57   : > { %2730 = vset.pattern.permute.xlu0 %v3060_v1  ;;  %v2731_v4 = vld [vmem:[%s3620_s8] ss:$0 sm:$0xff]  ;;  %v2732_v5 = vld [vmem:[%s3620_s8 + $0x1] ss:$0 sm:$0xff]  ;;  %v2733_v6 = vld [vmem:[%s3620_s8 + $0x2] ss:$0 sm:$0xff] }
  0x58   : > { %s3674_s30 = smov (!%p827_p3, %s3198_s30), 1  ;;  %v2734_v7 = vld [vmem:[%s3620_s8 + $0x7] ss:$0 sm:$0xff]  ;;  %v2735_v14 = vld [vmem:[%s3620_s8 + $0x3] ss:$0 sm:$0xff]  ;;  %vm898_vm0 = vcmask 130048  }
  0x59   : > { %s2614_s15 = sshll.u32 %s3674_s30, 4  ;;  %v2736_v19 = vld [vmem:[%s3620_s8 + $0x4] ss:$0 sm:$0xff]  ;;  %v2737_v20 = vld [vmem:[%s3620_s8 + $0x6] ss:$0 sm:$0xff]  ;;  %v849_v22 = vld [vmem:[%s3302_s16 + $0x10] sm:$0xff] }
  0x5a   : > { %v851_v23 = vld [vmem:[%s3302_s16 + $0x20] sm:$0xff]  ;;  %v861_v28 = vld [vmem:[%s3302_s16 + $0x70] sm:$0xff]  ;;  %v848_v34 = vld [vmem:[%s3302_s16 + $0x8] sm:$0xff]  ;;  %s2615_s20 = sshll.u32 %s3674_s30, 6  ;;  %s3662_s6 = sld [smem:[#allocation23_spill]]  ;;  %vm1291_vm3 = vcmask 261120  }
  0x5b   : > { %v2738_v25 = vld [vmem:[%s3620_s8 + $0x5] ss:$0 sm:$0xff]  ;;  %v850_v35 = vld [vmem:[%s3302_s16 + $0x18] sm:$0xff]  ;;  %v852_v36 = vld [vmem:[%s3302_s16 + $0x28] sm:$0xff]  ;;  %vm1315_vm4 = vcmask 64512   ;;  %s3663_s25 = sld [smem:[#allocation28_spill]] }
  0x5c   : > { %s831_s2 = scalar_lea.vmem %s3661_s22, %s2614_s15  ;;  %v862_v37 = vld [vmem:[%s3302_s16 + $0x78] sm:$0xff]  ;;  %v853_v38 = vld [vmem:[%s3302_s16 + $0x30] sm:$0xff]  ;;  %v855_v39 = vld [vmem:[%s3302_s16 + $0x40] sm:$0xff]  ;;  %s3664_s28 = sld [smem:[#allocation24_spill]]  ;;  %vm1859_vm6 = vcmask 1043456   ;;  %vm1855_vm7 = vcmask 31744  }
  0x5d   : > { %v846_v2 = vld [vmem:[%s831_s2 + $0x8] sm:$0xff]  ;;  %v845_v3 = vld [vmem:[%s831_s2] sm:$0xff]  ;;  %v857_v44 = vld [vmem:[%s3302_s16 + $0x50] sm:$0xff]  ;;  %vm1831_vm8 = vcmask 523264   ;;  %vm2322_vm11 = vcmask 3072   ;;  %vm2350_vm15 = vcmask 0  }
  0x5e   : > { %879 = vperm.xlu0 %2730, %v846_v2   ;;  %v859_v40 = vld [vmem:[%s3302_s16 + $0x60] sm:$0xff]  ;;  %v854_v41 = vld [vmem:[%s3302_s16 + $0x38] sm:$0xff]  ;;  %v856_v42 = vld [vmem:[%s3302_s16 + $0x48] sm:$0xff] }
  0x5f   : > { %v860_v43 = vld [vmem:[%s3302_s16 + $0x68] sm:$0xff]  ;;  %v858_v45 = vld [vmem:[%s3302_s16 + $0x58] sm:$0xff]  ;;  %s2616_s16 = sshll.u32 %s3674_s30, 5 }
  0x60   : > { %v2739_v49 = vld [vmem:[%s3621_s9] ss:$0 sm:$0xff]  ;;  %s3434_s26 = scalar_lea.vmem %s3662_s6, %s2615_s20  ;;  %s3665_s20 = sld [smem:[#allocation29_spill]] }
  0x61   : > { %v2740_v52 = vld [vmem:[%s3622_s10] ss:$0 sm:$0xff]  ;;  %s3666_s6 = sld [smem:[#allocation31_spill]] }
  0x62   : > { %s3494_s21 = scalar_lea.vmem %s3664_s28, %s2616_s16  ;;  %s3667_s16 = sld [smem:[#allocation30_spill]] }
  0x63   : > { %s3668_s28 = sld [smem:[#allocation32_spill]] }
  0x66   : > { %874 = vperm.xlu0 %2730, %v845_v3  }
  0xd0   : > { %v3344_v8 = vpop.permute.xlu0 %879 }
  0xd1   : > { %v897_v9 = vmul.f32 %v2731_v4, %v3344_v8  ;;  %v934_v10 = vmul.f32 %v2732_v5, %v3344_v8  ;;  %v970_v11 = vmul.f32 %v2733_v6, %v3344_v8  ;;  %v1150_v12 = vmul.f32 %v2734_v7, %v3344_v8 }
  0xd2   : > { %v1006_v24 = vmul.f32 %v2735_v14, %v3344_v8  ;;  %v1042_v26 = vmul.f32 %v2736_v19, %v3344_v8  ;;  %v1114_v27 = vmul.f32 %v2737_v20, %v3344_v8  ;;  %v1078_v32 = vmul.f32 %v2738_v25, %v3344_v8 }
  0xd3   : > { %919 = vmatpush.msra.mxu0 %v897_v9  ;;  %955 = vmatpush.msra.mxu1 %v934_v10  ;;  %v886_v57 = vmul.f32 %v2739_v49, %v3344_v8  ;;  %v1285_v8 = vld [vmem:[%s3624_s12 + $0x10] sm:$0xff] }
  0xd4   : > { %991 = vmatpush.msra.mxu2 %v970_v11  ;;  %1171 = vmatpush.msra.mxu3 %v1150_v12 }
  0xd5   : > { %v892_v62 = vadd.f32 %v2740_v52, %v886_v57  ;;  %v1262_v57 = vld [vmem:[#allocation11 + $0x58] sm:$0xff] }
  0xd8   : > { %v3350_v13 = vpop.permute.xlu0 %874 }
  0xd9   : > { %v896_v15 = vmul.f32 %v2731_v4, %v3350_v13  ;;  %v933_v16 = vmul.f32 %v2732_v5, %v3350_v13  ;;  %v969_v17 = vmul.f32 %v2733_v6, %v3350_v13  ;;  %v1149_v18 = vmul.f32 %v2734_v7, %v3350_v13  ;;  %v1286_v7 = vld [vmem:[%s3624_s12 + $0x18] sm:$0xff] }
  0xda   : > { %v1005_v29 = vmul.f32 %v2735_v14, %v3350_v13  ;;  %v1041_v30 = vmul.f32 %v2736_v19, %v3350_v13  ;;  %v1113_v31 = vmul.f32 %v2737_v20, %v3350_v13  ;;  %v1077_v33 = vmul.f32 %v2738_v25, %v3350_v13 }
  0xdb   : > { %920 = vmatpush.msra.mxu0 %v896_v15  ;;  %956 = vmatpush.msra.mxu1 %v933_v16  ;;  %v885_v51 = vmul.f32 %v2739_v49, %v3350_v13  ;;  %v1248_v49 = vld [vmem:[%s3434_s26 + $0x28] sm:$0xff] }
  0xdc   : > { %992 = vmatpush.msra.mxu2 %v969_v17  ;;  %1172 = vmatpush.msra.mxu3 %v1149_v18 }
  0xdd   : > { %2542 = vmatmul.msk.f32.vlgmr.msra.gmra.mxu0 %vm898_vm0, %v847_v21  ;;  %2544 = vmatmul.msk.f32.vlgmr.msra.gmra.mxu1 %vm898_vm0, %v849_v22  ;;  %v891_v54 = vadd.f32 %v2740_v52, %v885_v51  ;;  %v1250_v51 = vld [vmem:[%s3434_s26 + $0x38] sm:$0xff] }
  0xde   : > { %2546 = vmatmul.msk.f32.vlgmr.msra.gmra.mxu2 %vm898_vm0, %v851_v23  ;;  %1027 = vmatpush.msrb.mxu1 %v1006_v24  ;;  %v1255_v52 = vld [vmem:[#allocation11 + $0x20] sm:$0xff] }
  0xdf   : > { %1063 = vmatpush.msrb.mxu0 %v1042_v26  ;;  %1135 = vmatpush.msrb.mxu2 %v1114_v27 }
  0xe0   : > { %1028 = vmatpush.msrb.mxu1 %v1005_v29  ;;  %2556 = vmatmul.msk.f32.vlgmr.msra.gmra.mxu3 %vm898_vm0, %v861_v28 }
  0xe1   : > { %1064 = vmatpush.msrb.mxu0 %v1041_v30  ;;  %1136 = vmatpush.msrb.mxu2 %v1113_v31  ;;  %v1194_v31 = vld [vmem:[#allocation5] sm:$0xff] }
  0xe2   : > { %1099 = vmatpush.msra.mxu1 %v1078_v32  ;;  %v1218_v32 = vld [vmem:[#allocation7] sm:$0xff] }
  0xe3   : > { %1307 = vmatpush.msra.mxu2 %v1286_v7  ;;  %v1282_v7 = vld [vmem:[#allocation11 + $0xf8] sm:$0xff] }
  0xe4   : > { %1100 = vmatpush.msra.mxu1 %v1077_v33 }
  0xe5   : > { %2543 = vmatmul.msk.f32.gmra.mxu0 %vm898_vm0, %v848_v34  ;;  %2545 = vmatmul.msk.f32.gmra.mxu1 %vm898_vm0, %v850_v35  ;;  %v1284_v34 = vld [vmem:[%s3624_s12 + $0x8] sm:$0xff]  ;;  %v1283_v35 = vld [vmem:[%s3624_s12] sm:$0xff] }
  0xe6   : > { %2547 = vmatmul.msk.f32.gmra.mxu2 %vm898_vm0, %v852_v36  ;;  %v1258_v36 = vld [vmem:[#allocation11 + $0x38] sm:$0xff] }
  0xe7   : > { %1308 = vmatpush.msra.mxu2 %v1285_v8 }
  0xe8   : > { %2557 = vmatmul.msk.f32.gmra.mxu3 %vm898_vm0, %v862_v37  ;;  %v1257_v37 = vld [vmem:[#allocation11 + $0x30] sm:$0xff] }
  0xe9   : > { %1309 = vmatpush.msra.mxu2 %v1284_v34 }
  0xeb   : > { %1310 = vmatpush.msra.mxu2 %v1283_v35  ;;  %v1824_v35 = vld [vmem:[%s3663_s25 + $0x28] sm:$0xff] }
  0xed   : > { %2548 = vmatmul.msk.f32.vlgmr.msrb.gmra.mxu1 %vm898_vm0, %v853_v38  ;;  %2550 = vmatmul.msk.f32.vlgmr.msrb.gmra.mxu0 %vm898_vm0, %v855_v39  ;;  %v1254_v38 = vld [vmem:[#allocation11 + $0x18] sm:$0xff]  ;;  %v1253_v39 = vld [vmem:[#allocation11 + $0x10] sm:$0xff] }
  0xee   : > { %2554 = vmatmul.msk.f32.vlgmr.msrb.gmra.mxu2 %vm898_vm0, %v859_v40  ;;  %v1256_v40 = vld [vmem:[#allocation11 + $0x28] sm:$0xff] }
  0xef   : > { %1401 = vmatpush.msrb.mxu2 %v1258_v36 }
  0xf1   : > { %1402 = vmatpush.msrb.mxu2 %v1257_v37  ;;  %v1823_v37 = vld [vmem:[%s3663_s25 + $0x20] sm:$0xff] }
  0xf3   : > { %1403 = vmatpush.msrb.mxu2 %v1256_v40  ;;  %v1822_v40 = vld [vmem:[%s3663_s25 + $0x18] sm:$0xff] }
  0xf5   : > { %2549 = vmatmul.msk.f32.gmra.mxu1 %vm898_vm0, %v854_v41  ;;  %2551 = vmatmul.msk.f32.gmra.mxu0 %vm898_vm0, %v856_v42 }
  0xf6   : > { %2555 = vmatmul.msk.f32.gmra.mxu2 %vm898_vm0, %v860_v43 }
  0xf7   : > { %1404 = vmatpush.msrb.mxu2 %v1255_v52 }
  0xfd   : > { %2552 = vmatmul.msk.f32.vlgmr.msra.gmra.mxu1 %vm898_vm0, %v857_v44  ;;  %v1243_v44 = vld [vmem:[%s3434_s26] sm:$0xff] }
 0x105   : > { %2553 = vmatmul.msk.f32.gmra.mxu1 %vm898_vm0, %v858_v45  ;;  %v1244_v45 = vld [vmem:[%s3434_s26 + $0x8] sm:$0xff] }
 0x15a   : > { %v958_v46 = vpop.f32.mrf.mxu1  ;;  %v922_v47 = vpop.f32.mrf.mxu0 }
 0x15b   : > { %v928_v56 = vadd.f32 %v922_v47, %v891_v54  ;;  %v1246_v47 = vld [vmem:[%s3434_s26 + $0x18] sm:$0xff] }
 0x15c   : > { %v1266_v54 = vld [vmem:[#allocation11 + $0x78] sm:$0xff] }
 0x15d   : > { %v964_v59 = vadd.f32 %v958_v46, %v928_v56  ;;  %v1245_v46 = vld [vmem:[%s3434_s26 + $0x10] sm:$0xff] }
 0x15e   : > { %v1265_v56 = vld [vmem:[#allocation11 + $0x70] sm:$0xff] }
 0x161   : > { %v994_v50 = vpop.f32.mrf.mxu2 }
 0x162   : > { %v961_v48 = vpop.f32.mrf.mxu1  ;;  %v925_v55 = vpop.f32.mrf.mxu0  ;;  %v1000_v61 = vadd.f32 %v994_v50, %v964_v59  ;;  %v1249_v50 = vld [vmem:[%s3434_s26 + $0x30] sm:$0xff] }
 0x163   : > { %v929_v0 = vadd.f32 %v925_v55, %v892_v62  ;;  %v1174_v6 = vpop.f32.mrf.mxu3  ;;  %v1251_v55 = vld [vmem:[#allocation11] sm:$0xff]  ;;  %v1261_v59 = vld [vmem:[#allocation11 + $0x50] sm:$0xff] }
 0x164   : > { %v1259_v62 = vld [vmem:[#allocation11 + $0x40] sm:$0xff] }
 0x165   : > { %v965_v3 = vadd.f32 %v961_v48, %v929_v0  ;;  %v1247_v48 = vld [vmem:[%s3434_s26 + $0x20] sm:$0xff] }
 0x169   : > { %v997_v58 = vpop.f32.mrf.mxu2 }
 0x16a   : > { %v1030_v53 = vpop.f32.mrf.mxu1  ;;  %v1066_v63 = vpop.f32.mrf.mxu0  ;;  %v1001_v9 = vadd.f32 %v997_v58, %v965_v3  ;;  %v1264_v58 = vld [vmem:[#allocation11 + $0x68] sm:$0xff]  ;;  %v1270_v3 = vld [vmem:[#allocation11 + $0x98] sm:$0xff] }
 0x16b   : > { %v1036_v1 = vadd.f32 %v1030_v53, %v1000_v61  ;;  %v1177_v20 = vpop.f32.mrf.mxu3  ;;  %v1252_v53 = vld [vmem:[#allocation11 + $0x8] sm:$0xff] }
 0x16c   : > { %v1260_v61 = vld [vmem:[#allocation11 + $0x48] sm:$0xff] }
 0x16d   : > { %v1072_v4 = vadd.f32 %v1066_v63, %v1036_v1  ;;  %v1274_v63 = vld [vmem:[#allocation11 + $0xb8] sm:$0xff]  ;;  %v1273_v1 = vld [vmem:[#allocation11 + $0xb0] sm:$0xff] }
 0x171   : > { %v1138_v2 = vpop.f32.mrf.mxu2 }
 0x172   : > { %v1033_v60 = vpop.f32.mrf.mxu1  ;;  %v1069_v13 = vpop.f32.mrf.mxu0 }
 0x173   : > { %v1037_v11 = vadd.f32 %v1033_v60, %v1001_v9  ;;  %v1263_v60 = vld [vmem:[#allocation11 + $0x60] sm:$0xff]  ;;  %v1268_v9 = vld [vmem:[#allocation11 + $0x88] sm:$0xff] }
 0x175   : > { %v1073_v15 = vadd.f32 %v1069_v13, %v1037_v11  ;;  %v1267_v11 = vld [vmem:[#allocation11 + $0x80] sm:$0xff]  ;;  %v1278_v13 = vld [vmem:[#allocation11 + $0xd8] sm:$0xff] }
 0x179   : > { %v1141_v17 = vpop.f32.mrf.mxu2 }
 0x17a   : > { %v1102_v5 = vpop.f32.mrf.mxu1 }
 0x17b   : > { %v1108_v10 = vadd.f32 %v1102_v5, %v1072_v4  ;;  %v1271_v5 = vld [vmem:[#allocation11 + $0xa0] sm:$0xff] }
 0x17d   : > { %v1144_v12 = vadd.f32 %v1138_v2, %v1108_v10  ;;  %v1272_v2 = vld [vmem:[#allocation11 + $0xa8] sm:$0xff]  ;;  %v1281_v10 = vld [vmem:[#allocation11 + $0xf0] sm:$0xff] }
 0x17f   : > { %v1180_v14 = vadd.f32 %v1174_v6, %v1144_v12  ;;  %v1269_v6 = vld [vmem:[#allocation11 + $0x90] sm:$0xff]  ;;  %v1280_v12 = vld [vmem:[#allocation11 + $0xe8] sm:$0xff] }
 0x181   : > { %v1184_v18 = vmin.f32 %v1180_v14, 0.0  ;;  %vm1182_vm2 = vcmp.gt.f32.partialorder %v1180_v14, 0.0 }
 0x182   : > { %v1105_v16 = vpop.f32.mrf.mxu1 }
 0x183   : > { %v1109_v19 = vadd.f32 %v1105_v16, %v1073_v15  ;;  %v1186_v22 = vmul.f32 1.442695, %v1184_v18  ;;  %v1279_v15 = vld [vmem:[#allocation11 + $0xe0] sm:$0xff]  ;;  %v1277_v16 = vld [vmem:[#allocation11 + $0xd0] sm:$0xff]  ;;  %v1276_v18 = vld [vmem:[#allocation11 + $0xc8] sm:$0xff] }
 0x185   : > { %v1145_v21 = vadd.f32 %v1141_v17, %v1109_v19  ;;  %2745 = vpow2.f32 %v1186_v22  ;;  %v1275_v19 = vld [vmem:[#allocation11 + $0xc0] sm:$0xff] }
 0x187   : > { %v1181_v23 = vadd.f32 %v1177_v20, %v1145_v21 }
 0x189   : > { %v1185_v24 = vmin.f32 %v1181_v23, 0.0  ;;  %vm1183_vm1 = vcmp.gt.f32.partialorder %v1181_v23, 0.0 }
 0x18b   : > { %v1188_v25 = vmul.f32 1.442695, %v1185_v24  ;;  %v2746_v26 = vpop.eup %2745 }
 0x18c   : > { %v2558_v29 = vadd.f32 -1.0, %v2746_v26 }
 0x18d   : > { %2747 = vpow2.f32 %v1188_v25  ;;  %v2741_v25 = vld [vmem:[%s3625_s13] ss:$0 sm:$0xff] }
 0x18e   : > { %v1192_v33 = vsel %vm1182_vm2, %v1180_v14, %v2558_v29 }
 0x193   : > { %v2748_v27 = vpop.eup %2747 }
 0x194   : > { %v2559_v28 = vadd.f32 -1.0, %v2748_v27 }
 0x196   : > { %v1193_v30 = vsel %vm1183_vm1, %v1181_v23, %v2559_v28 }
 0x197   : > { %1212 = vmatpush.msra.mxu0 %v1193_v30  ;;  %1236 = vmatpush.msrb.mxu1 %v1193_v30 }
 0x199   : > { %1213 = vmatpush.msra.mxu0 %v1192_v33  ;;  %1237 = vmatpush.msrb.mxu1 %v1192_v33  ;;  %v1825_v33 = vld [vmem:[%s3663_s25 + $0x30] sm:$0xff] }
 0x19a   : > { %2560 = vmatmul.msk.f32.vlgmr.msra.gmra.mxu0 %vm898_vm0, %v1194_v31  ;;  %2561 = vmatmul.msk.f32.vlgmr.msrb.gmra.mxu1 %vm898_vm0, %v1218_v32  ;;  %v1826_v32 = vld [vmem:[%s3663_s25 + $0x38] sm:$0xff] }
 0x19b   : > { %1354 = vmatpush.msrb.mxu0 %v1254_v38 }
 0x19d   : > { %1355 = vmatpush.msrb.mxu0 %v1253_v39 }
 0x19f   : > { %1356 = vmatpush.msrb.mxu0 %v1252_v53 }
 0x1a1   : > { %1357 = vmatpush.msrb.mxu0 %v1251_v55 }
 0x1a3   : > { %1448 = vmatpush.msra.mxu0 %v1262_v57  ;;  %v1722_v57 = vld [vmem:[#allocation10] sm:$0xf] }
 0x1a5   : > { %1449 = vmatpush.msra.mxu0 %v1261_v59  ;;  %v1762_v59 = vld [vmem:[#allocation13 + $0x38] sm:$0xff] }
 0x1a7   : > { %1450 = vmatpush.msra.mxu0 %v1260_v61  ;;  %v1760_v61 = vld [vmem:[#allocation13 + $0x28] sm:$0xff] }
 0x1a9   : > { %1451 = vmatpush.msra.mxu0 %v1259_v62  ;;  %v1776_v62 = vld [vmem:[#allocation13 + $0xa8] sm:$0xff] }
 0x217   : > { %v1215_v41 = vpop.f32.mrf.mxu0  ;;  %v1239_v42 = vpop.f32.mrf.mxu1 }
 0x218   : > { %v1242_v43 = vmax.f32 %v1215_v41, %v1239_v42  ;;  %v1821_v42 = vld [vmem:[%s3663_s25 + $0x10] sm:$0xff] }
 0x21a   : > { %2562 = vmatmul.msk.f32.vlgmr.msra.gmra.mxu2 %vm1291_vm3, %v1242_v43  ;;  %1334 = vmatpush.msrb.mxu3 %v1242_v43 }
 0x21b   : > { %1381 = vmatpush.msra.mxu1 %v1242_v43  ;;  %2563 = vmatmul.msk.f32.vlgmr.msrb.gmra.mxu3 %vm1315_vm4, %v1243_v44 }
 0x21c   : > { %2565 = vmatmul.msk.f32.vlgmr.msra.gmra.mxu1 %vm1315_vm4, %v1244_v45  ;;  %1428 = vmatpush.msra.mxu3 %v1242_v43 }
 0x21d   : > { %1475 = vmatpush.msrb.mxu1 %v1242_v43  ;;  %1495 = vmatpush.msra.mxu2 %v1266_v54 }
 0x21e   : > { %1522 = vmatpush.msrb.mxu3 %v1242_v43 }
 0x21f   : > { %1569 = vmatpush.msra.mxu1 %v1242_v43  ;;  %1496 = vmatpush.msra.mxu2 %v1265_v56  ;;  %v1698_v56 = vld [vmem:[#allocation8] sm:$0xf] }
 0x221   : > { %1497 = vmatpush.msra.mxu2 %v1264_v58 }
 0x223   : > { %2567 = vmatmul.msk.f32.vlgmr.msra.gmra.mxu3 %vm1315_vm4, %v1245_v46  ;;  %1498 = vmatpush.msra.mxu2 %v1263_v60  ;;  %v1819_v46 = vld [vmem:[%s3663_s25] sm:$0xff]  ;;  %v1761_v60 = vld [vmem:[#allocation13 + $0x30] sm:$0xff] }
 0x224   : > { %2569 = vmatmul.msk.f32.vlgmr.msrb.gmra.mxu1 %vm1315_vm4, %v1246_v47  ;;  %1616 = vmatpush.msra.mxu3 %v1242_v43 }
 0x225   : > { %1663 = vmatpush.msrb.mxu1 %v1242_v43  ;;  %v1820_v43 = vld [vmem:[%s3663_s25 + $0x8] sm:$0xff] }
 0x22b   : > { %2571 = vmatmul.msk.f32.vlgmr.msrb.gmra.mxu3 %vm1315_vm4, %v1247_v48 }
 0x22c   : > { %2573 = vmatmul.msk.f32.vlgmr.msra.gmra.mxu1 %vm1315_vm4, %v1248_v49  ;;  %v1778_v49 = vld [vmem:[#allocation13 + $0xb8] sm:$0xff] }
 0x22d   : > { %1843 = vmatpush.msra.mxu1 %v1826_v32 }
 0x22f   : > { %1844 = vmatpush.msra.mxu1 %v1825_v33  ;;  %v1801_v33 = vld [vmem:[#allocation13 + $0x170] sm:$0xff] }
 0x231   : > { %1845 = vmatpush.msra.mxu1 %v1824_v35 }
 0x233   : > { %2575 = vmatmul.msk.f32.vlgmr.msra.gmra.mxu3 %vm1315_vm4, %v1249_v50  ;;  %1846 = vmatpush.msra.mxu1 %v1823_v37  ;;  %v1751_v37 = vld [vmem:[%s3494_s21 + $0x10] sm:$0xf] }
 0x234   : > { %2577 = vmatmul.msk.f32.vlgmr.msrb.gmra.mxu1 %vm1315_vm4, %v1250_v51  ;;  %v1777_v51 = vld [vmem:[#allocation13 + $0xb0] sm:$0xff] }
 0x235   : > { %1847 = vmatpush.msra.mxu1 %v1822_v40  ;;  %v1791_v40 = vld [vmem:[#allocation13 + $0x120] sm:$0xff] }
 0x237   : > { %1848 = vmatpush.msra.mxu1 %v1821_v42  ;;  %v1790_v42 = vld [vmem:[#allocation13 + $0x118] sm:$0xff] }
 0x239   : > { %1849 = vmatpush.msra.mxu1 %v1820_v43  ;;  %v1789_v43 = vld [vmem:[#allocation13 + $0x110] sm:$0xff] }
 0x23b   : > { %1850 = vmatpush.msra.mxu1 %v1819_v46  ;;  %v1787_v46 = vld [vmem:[#allocation13 + $0x100] sm:$0xff] }
 0x23d   : > { %1987 = vmatpush.msrb.mxu1 %v1778_v49  ;;  %v1798_v49 = vld [vmem:[#allocation13 + $0x158] sm:$0xff] }
 0x23f   : > { %1988 = vmatpush.msrb.mxu1 %v1777_v51  ;;  %v1796_v51 = vld [vmem:[#allocation13 + $0x148] sm:$0xff] }
 0x241   : > { %1989 = vmatpush.msrb.mxu1 %v1776_v62 }
 0x299   : > { %v1383_v0 = vpop.f32.mrf.mxu1 }
 0x29a   : > { %2566 = vmatmul.msk.f32.vlgmr.msrb.gmra.mxu2 %vm1291_vm3, %v1383_v0  ;;  %v1775_v0 = vld [vmem:[#allocation13 + $0xa0] sm:$0xff] }
 0x29b   : > { %1589 = vmatpush.msrb.mxu2 %v1274_v63  ;;  %v1759_v63 = vld [vmem:[#allocation13 + $0x20] sm:$0xff]  ;;  %1990 = vmatpush.msrb.mxu1 %v1775_v0 }
 0x29d   : > { %1590 = vmatpush.msrb.mxu2 %v1273_v1  ;;  %v1312_v23 = vpop.f32.mrf.mxu2  ;;  %v1758_v1 = vld [vmem:[#allocation13 + $0x18] sm:$0xff] }
 0x29e   : > { %v1336_v4 = vpop.f32.mrf.mxu3  ;;  %v1313_v27 = vadd.f32 %v2741_v25, %v1312_v23  ;;  %v1749_v23 = vld [vmem:[%s3494_s21 + $0x8] sm:$0xf] }
 0x29f   : > { %2564 = vmatmul.msk.f32.vlgmr.msrb.gmra.mxu0 %vm1291_vm3, %v1336_v4  ;;  %1591 = vmatpush.msrb.mxu2 %v1272_v2  ;;  %v1774_v2 = vld [vmem:[#allocation13 + $0x98] sm:$0xff]  ;;  %v1773_v4 = vld [vmem:[#allocation13 + $0x90] sm:$0xff] }
 0x2a0   : > { %1542 = vmatpush.msrb.mxu0 %v1270_v3  ;;  %1991 = vmatpush.msrb.mxu1 %v1774_v2  ;;  %v1757_v3 = vld [vmem:[#allocation13 + $0x10] sm:$0xff] }
 0x2a1   : > { %v1477_v8 = vpop.f32.mrf.mxu1  ;;  %1592 = vmatpush.msrb.mxu2 %v1271_v5  ;;  %v1756_v5 = vld [vmem:[#allocation13 + $0x8] sm:$0xff]  ;;  %v1765_v25 = vld [vmem:[#allocation13 + $0x50] sm:$0xff] }
 0x2a2   : > { %2570 = vmatmul.msk.f32.vlgmr.msra.gmra.mxu2 %vm1291_vm3, %v1477_v8  ;;  %1543 = vmatpush.msrb.mxu0 %v1269_v6  ;;  %v1772_v6 = vld [vmem:[#allocation13 + $0x88] sm:$0xff]  ;;  %v1771_v8 = vld [vmem:[#allocation13 + $0x80] sm:$0xff] }
 0x2a3   : > { %1683 = vmatpush.msra.mxu2 %v1282_v7  ;;  %1992 = vmatpush.msrb.mxu1 %v1773_v4  ;;  %v1755_v7 = vld [vmem:[#allocation13] sm:$0xff] }
 0x2a4   : > { %1544 = vmatpush.msrb.mxu0 %v1268_v9 }
 0x2a5   : > { %1684 = vmatpush.msra.mxu2 %v1281_v10  ;;  %1993 = vmatpush.msrb.mxu1 %v1772_v6  ;;  %v1754_v6 = vld [vmem:[%s3494_s21 + $0x1c] sm:$0xf] }
 0x2a6   : > { %v1430_v14 = vpop.f32.mrf.mxu3  ;;  %1545 = vmatpush.msrb.mxu0 %v1267_v11 }
 0x2a7   : > { %2568 = vmatmul.msk.f32.vlgmr.msra.gmra.mxu0 %vm1291_vm3, %v1430_v14  ;;  %1685 = vmatpush.msra.mxu2 %v1280_v12  ;;  %v1747_v12 = vld [vmem:[%s3494_s21] sm:$0xf]  ;;  %v1748_v14 = vld [vmem:[%s3494_s21 + $0x4] sm:$0xf] }
 0x2a8   : > { %1636 = vmatpush.msra.mxu0 %v1278_v13  ;;  %1994 = vmatpush.msrb.mxu1 %v1771_v8  ;;  %v1770_v13 = vld [vmem:[#allocation13 + $0x78] sm:$0xff]  ;;  %v1807_v8 = vld [vmem:[#allocation13 + $0x1a0] sm:$0xff] }
 0x2a9   : > { %v1571_v17 = vpop.f32.mrf.mxu1  ;;  %1686 = vmatpush.msra.mxu2 %v1279_v15  ;;  %v1786_v15 = vld [vmem:[#allocation13 + $0xf8] sm:$0xff] }
 0x2aa   : > { %2574 = vmatmul.msk.f32.vlgmr.msrb.gmra.mxu2 %vm1291_vm3, %v1571_v17  ;;  %1637 = vmatpush.msra.mxu0 %v1277_v16  ;;  %v1769_v16 = vld [vmem:[#allocation13 + $0x70] sm:$0xff] }
 0x2ab   : > { %v1785_v17 = vld [vmem:[#allocation13 + $0xf0] sm:$0xff] }
 0x2ac   : > { %1638 = vmatpush.msra.mxu0 %v1276_v18  ;;  %v1768_v18 = vld [vmem:[#allocation13 + $0x68] sm:$0xff] }
 0x2ae   : > { %v1524_v20 = vpop.f32.mrf.mxu3  ;;  %1639 = vmatpush.msra.mxu0 %v1275_v19  ;;  %v1784_v19 = vld [vmem:[#allocation13 + $0xe8] sm:$0xff] }
 0x2af   : > { %2572 = vmatmul.msk.f32.vlgmr.msrb.gmra.mxu0 %vm1291_vm3, %v1524_v20  ;;  %v1767_v20 = vld [vmem:[#allocation13 + $0x60] sm:$0xff] }
 0x2b1   : > { %v1665_v21 = vpop.f32.mrf.mxu1 }
 0x2b2   : > { %2578 = vmatmul.msk.f32.vlgmr.msra.gmra.mxu2 %vm1291_vm3, %v1665_v21  ;;  %v1783_v21 = vld [vmem:[#allocation13 + $0xe0] sm:$0xff] }
 0x2b6   : > { %v1618_v22 = vpop.f32.mrf.mxu3 }
 0x2b7   : > { %2576 = vmatmul.msk.f32.vlgmr.msra.gmra.mxu0 %vm1291_vm3, %v1618_v22  ;;  %v1766_v22 = vld [vmem:[#allocation13 + $0x58] sm:$0xff] }
 0x31c   : > { %v1359_v24 = vpop.f32.mrf.mxu0 }
 0x31d   : > { %v1406_v26 = vpop.f32.mrf.mxu2  ;;  %v1362_v28 = vadd.f32 %v1359_v24, %v1313_v27  ;;  %v1782_v24 = vld [vmem:[#allocation13 + $0xd8] sm:$0xff]  ;;  %v1764_v27 = vld [vmem:[#allocation13 + $0x48] sm:$0xff] }
 0x31f   : > { %v1409_v31 = vadd.f32 %v1406_v26, %v1362_v28  ;;  %v1781_v26 = vld [vmem:[#allocation13 + $0xd0] sm:$0xff]  ;;  %v1780_v28 = vld [vmem:[#allocation13 + $0xc8] sm:$0xff] }
 0x324   : > { %v1453_v29 = vpop.f32.mrf.mxu0 }
 0x325   : > { %v1500_v30 = vpop.f32.mrf.mxu2  ;;  %v1456_v34 = vadd.f32 %v1453_v29, %v1409_v31  ;;  %v1763_v29 = vld [vmem:[#allocation13 + $0x40] sm:$0xff]  ;;  %v1802_v31 = vld [vmem:[#allocation13 + $0x178] sm:$0xff] }
 0x327   : > { %v1503_v38 = vadd.f32 %v1500_v30, %v1456_v34  ;;  %v1779_v30 = vld [vmem:[#allocation13 + $0xc0] sm:$0xff]  ;;  %v1794_v34 = vld [vmem:[#allocation13 + $0x138] sm:$0xff] }
 0x32c   : > { %v1547_v36 = vpop.f32.mrf.mxu0 }
 0x32d   : > { %v1594_v39 = vpop.f32.mrf.mxu2  ;;  %v1550_v41 = vadd.f32 %v1547_v36, %v1503_v38  ;;  %v1793_v36 = vld [vmem:[#allocation13 + $0x130] sm:$0xff] }
 0x32f   : > { %v1597_v44 = vadd.f32 %v1594_v39, %v1550_v41  ;;  %v1792_v39 = vld [vmem:[#allocation13 + $0x128] sm:$0xff]  ;;  %v1750_v41 = vld [vmem:[%s3494_s21 + $0xc] sm:$0xf] }
 0x334   : > { %v1641_v45 = vpop.f32.mrf.mxu0 }
 0x335   : > { %v1644_v47 = vadd.f32 %v1641_v45, %v1597_v44  ;;  %v1688_v48 = vpop.f32.mrf.mxu2  ;;  %v1752_v44 = vld [vmem:[%s3494_s21 + $0x14] sm:$0xf]  ;;  %v1788_v45 = vld [vmem:[#allocation13 + $0x108] sm:$0xff] }
 0x337   : > { %v1691_v50 = vadd.f32 %v1688_v48, %v1644_v47  ;;  %v1800_v47 = vld [vmem:[#allocation13 + $0x168] sm:$0xff]  ;;  %v1799_v48 = vld [vmem:[#allocation13 + $0x160] sm:$0xff] }
 0x339   : > { %v1693_v52 = vmin.f32 %v1691_v50, 0.0  ;;  %vm1692_vm5 = vcmp.gt.f32.partialorder %v1691_v50, 0.0 }
 0x33b   : > { %v1694_v53 = vmul.f32 1.442695, %v1693_v52  ;;  %v1795_v52 = vld [vmem:[#allocation13 + $0x140] sm:$0xff] }
 0x33d   : > { %2749 = vpow2.f32 %v1694_v53  ;;  %v1810_v53 = vld [vmem:[#allocation13 + $0x1b8] sm:$0xff] }
 0x343   : > { %v2750_v54 = vpop.eup %2749 }
 0x344   : > { %v2579_v55 = vadd.f32 -1.0, %v2750_v54  ;;  %v1809_v54 = vld [vmem:[#allocation13 + $0x1b0] sm:$0xff] }
 0x346   : > { %v1697_v58 = vsel %vm1692_vm5, %v1691_v50, %v2579_v55  ;;  %v1797_v50 = vld [vmem:[#allocation13 + $0x150] sm:$0xff]  ;;  %v1808_v55 = vld [vmem:[#allocation13 + $0x1a8] sm:$0xff] }
 0x347   : > { %1717 = vmatpush.msrb.mxu3 %v1697_v58  ;;  %1741 = vmatpush.msrb.mxu0 %v1697_v58 }
 0x348   : > { %2580 = vmatmul.msk.f32.vlgmr.msrb.gmra.mxu3 %vm1315_vm4, %v1698_v56  ;;  %2581 = vmatmul.msk.f32.vlgmr.msrb.gmra.mxu0 %vm1315_vm4, %v1722_v57  ;;  %v2742_v57 = vld [vmem:[%s3665_s20] ss:$0 sm:$0xff] }
 0x349   : > { %1893 = vmatpush.msra.mxu3 %v1762_v59 }
 0x34b   : > { %1894 = vmatpush.msra.mxu3 %v1761_v60 }
 0x34d   : > { %1895 = vmatpush.msra.mxu3 %v1760_v61 }
 0x34f   : > { %1896 = vmatpush.msra.mxu3 %v1759_v63 }
 0x351   : > { %1897 = vmatpush.msra.mxu3 %v1758_v1 }
 0x353   : > { %1898 = vmatpush.msra.mxu3 %v1757_v3  ;;  %v1818_v3 = vld [vmem:[#allocation13 + $0x1f8] sm:$0xff] }
 0x355   : > { %1899 = vmatpush.msra.mxu3 %v1756_v5  ;;  %v1817_v5 = vld [vmem:[#allocation13 + $0x1f0] sm:$0xff] }
 0x357   : > { %1900 = vmatpush.msra.mxu3 %v1755_v7  ;;  %v1753_v7 = vld [vmem:[%s3494_s21 + $0x18] sm:$0xf]  ;;  %s844_s21 = scalar_lea.vmem %s3668_s28, %s3674_s30 }
 0x3c5   : > { %v1743_v9 = vpop.f32.mrf.mxu0 }
 0x3cb   : > { %v1719_v10 = vpop.f32.mrf.mxu3 }
 0x3cc   : > { %v3496_v11 = vmax.f32 %v1719_v10, %v1743_v9  ;;  %v1816_v9 = vld [vmem:[#allocation13 + $0x1e8] sm:$0xff]  ;;  %v1806_v10 = vld [vmem:[#allocation13 + $0x198] sm:$0xff] }
 0x3ce   : > { %2583 = vmatpush.msk.msrb.mxu2 %vm1859_vm6, %v3496_v11  ;;  %2586 = vmatpush.msk.msra.mxu0 %vm1859_vm6, %v3496_v11 }
 0x3cf   : > { %2584 = vmatmul.msk.f32.vlgmr.msrb.gmra.mxu2 %vm1855_vm7, %v1747_v12  ;;  %2587 = vmatmul.msk.f32.vlgmr.msra.gmra.mxu0 %vm1855_vm7, %v1748_v14  ;;  %v1805_v12 = vld [vmem:[#allocation13 + $0x190] sm:$0xff]  ;;  %v1804_v14 = vld [vmem:[#allocation13 + $0x188] sm:$0xff] }
 0x3d0   : > { %2589 = vmatpush.msk.msrb.mxu0 %vm1859_vm6, %v3496_v11  ;;  %1940 = vmatpush.msra.mxu2 %v1770_v13  ;;  %v1814_v13 = vld [vmem:[#allocation13 + $0x1d8] sm:$0xff] }
 0x3d1   : > { %2582 = vmatmul.msk.f32.vlgmr.msra.gmra.mxu1 %vm1831_vm8, %v3496_v11  ;;  %2592 = vmatpush.msk.msrb.mxu3 %vm1859_vm6, %v3496_v11 }
 0x3d2   : > { %2034 = vmatpush.msra.mxu0 %v1786_v15  ;;  %1941 = vmatpush.msra.mxu2 %v1769_v16  ;;  %v1813_v15 = vld [vmem:[#allocation13 + $0x1d0] sm:$0xff]  ;;  %v1803_v16 = vld [vmem:[#allocation13 + $0x180] sm:$0xff] }
 0x3d3   : > { %2598 = vmatpush.msk.msra.mxu1 %vm1859_vm6, %v3496_v11 }
 0x3d4   : > { %2035 = vmatpush.msra.mxu0 %v1785_v17  ;;  %1942 = vmatpush.msra.mxu2 %v1768_v18  ;;  %v1812_v17 = vld [vmem:[#allocation13 + $0x1c8] sm:$0xff]  ;;  %v1811_v18 = vld [vmem:[#allocation13 + $0x1c0] sm:$0xff] }
 0x3d6   : > { %2036 = vmatpush.msra.mxu0 %v1784_v19  ;;  %1943 = vmatpush.msra.mxu2 %v1767_v20 }
 0x3d7   : > { %2590 = vmatmul.msk.f32.vlgmr.msrb.gmra.mxu0 %vm1855_vm7, %v1749_v23 }
 0x3d8   : > { %2037 = vmatpush.msra.mxu0 %v1783_v21  ;;  %1944 = vmatpush.msra.mxu2 %v1766_v22 }
 0x3da   : > { %2038 = vmatpush.msra.mxu0 %v1782_v24  ;;  %1945 = vmatpush.msra.mxu2 %v1765_v25  ;;  %v2248_v25 = vld [vmem:[#allocation14 + $0x38] sm:$0xff] }
 0x3dc   : > { %2039 = vmatpush.msra.mxu0 %v1781_v26  ;;  %1946 = vmatpush.msra.mxu2 %v1764_v27  ;;  %v2247_v26 = vld [vmem:[#allocation14 + $0x30] sm:$0xff]  ;;  %v2246_v27 = vld [vmem:[#allocation14 + $0x28] sm:$0xff] }
 0x3de   : > { %2040 = vmatpush.msra.mxu0 %v1780_v28  ;;  %1947 = vmatpush.msra.mxu2 %v1763_v29  ;;  %v2245_v28 = vld [vmem:[#allocation14 + $0x20] sm:$0xff]  ;;  %v2244_v29 = vld [vmem:[#allocation14 + $0x18] sm:$0xff] }
 0x3e0   : > { %2041 = vmatpush.msra.mxu0 %v1779_v30  ;;  %2595 = vmatpush.msk.msrb.mxu2 %vm1859_vm6, %v3496_v11  ;;  %v2243_v30 = vld [vmem:[#allocation14 + $0x10] sm:$0xff] }
 0x3e2   : > { %2601 = vmatpush.msk.msrb.mxu0 %vm1859_vm6, %v3496_v11 }
 0x44c   : > { %v1926_v32 = vpop.f32.mrf.mxu0 }
 0x44d   : > { %2588 = vmatmul.msk.f32.vlgmr.msra.gmra.mxu2 %vm1831_vm8, %v1926_v32  ;;  %v2297_v32 = vld [vmem:[%s3666_s6 + $0x78] sm:$0xff] }
 0x44e   : > { %2128 = vmatpush.msra.mxu2 %v1802_v31  ;;  %v1852_v56 = vpop.f32.mrf.mxu1  ;;  %v2242_v31 = vld [vmem:[#allocation14 + $0x8] sm:$0xff] }
 0x44f   : > { %v1853_v60 = vadd.f32 %v2742_v57, %v1852_v56  ;;  %v2285_v56 = vld [vmem:[%s3666_s6 + $0x18] sm:$0xff]  ;;  %v2284_v57 = vld [vmem:[%s3666_s6 + $0x10] sm:$0xff] }
 0x450   : > { %2129 = vmatpush.msra.mxu2 %v1801_v33  ;;  %v2296_v33 = vld [vmem:[%s3666_s6 + $0x70] sm:$0xff] }
 0x452   : > { %v1879_v35 = vpop.f32.mrf.mxu2  ;;  %2130 = vmatpush.msra.mxu2 %v1800_v47 }
 0x453   : > { %2585 = vmatmul.msk.f32.vlgmr.msra.gmra.mxu3 %vm1831_vm8, %v1879_v35  ;;  %v2295_v35 = vld [vmem:[%s3666_s6 + $0x68] sm:$0xff] }
 0x454   : > { %2081 = vmatpush.msra.mxu3 %v1794_v34  ;;  %v1973_v38 = vpop.f32.mrf.mxu0  ;;  %2131 = vmatpush.msra.mxu2 %v1799_v48  ;;  %v2241_v34 = vld [vmem:[#allocation14] sm:$0xff] }
 0x455   : > { %2591 = vmatmul.msk.f32.vlgmr.msrb.gmra.mxu1 %vm1831_vm8, %v1973_v38  ;;  %2596 = vmatmul.msk.f32.vlgmr.msrb.gmra.mxu2 %vm1855_vm7, %v1751_v37  ;;  %v2293_v37 = vld [vmem:[%s3666_s6 + $0x58] sm:$0xff]  ;;  %v2292_v38 = vld [vmem:[%s3666_s6 + $0x50] sm:$0xff] }
 0x456   : > { %2082 = vmatpush.msra.mxu3 %v1793_v36  ;;  %2132 = vmatpush.msra.mxu2 %v1798_v49  ;;  %v2294_v36 = vld [vmem:[%s3666_s6 + $0x60] sm:$0xff] }
 0x457   : > { %2175 = vmatpush.msrb.mxu1 %v1810_v53  ;;  %v2288_v53 = vld [vmem:[%s3666_s6 + $0x30] sm:$0xff] }
 0x458   : > { %2083 = vmatpush.msra.mxu3 %v1792_v39  ;;  %2133 = vmatpush.msra.mxu2 %v1797_v50 }
 0x459   : > { %2176 = vmatpush.msrb.mxu1 %v1809_v54  ;;  %v2287_v54 = vld [vmem:[%s3666_s6 + $0x28] sm:$0xff] }
 0x45a   : > { %2084 = vmatpush.msra.mxu3 %v1791_v40  ;;  %2134 = vmatpush.msra.mxu2 %v1796_v51  ;;  %v2291_v40 = vld [vmem:[%s3666_s6 + $0x48] sm:$0xff]  ;;  %v2290_v51 = vld [vmem:[%s3666_s6 + $0x40] sm:$0xff] }
 0x45b   : > { %2593 = vmatmul.msk.f32.vlgmr.msrb.gmra.mxu3 %vm1855_vm7, %v1750_v41  ;;  %2177 = vmatpush.msrb.mxu1 %v1808_v55  ;;  %v2286_v55 = vld [vmem:[%s3666_s6 + $0x20] sm:$0xff] }
 0x45c   : > { %2085 = vmatpush.msra.mxu3 %v1790_v42  ;;  %2135 = vmatpush.msra.mxu2 %v1795_v52  ;;  %v2289_v52 = vld [vmem:[%s3666_s6 + $0x38] sm:$0xff] }
 0x45d   : > { %2599 = vmatmul.msk.f32.vlgmr.msra.gmra.mxu1 %vm1855_vm7, %v1752_v44 }
 0x45e   : > { %2086 = vmatpush.msra.mxu3 %v1789_v43  ;;  %2178 = vmatpush.msrb.mxu1 %v1807_v8 }
 0x45f   : > { %2264 = vmatpush.msrb.mxu2 %v2248_v25 }
 0x460   : > { %2087 = vmatpush.msra.mxu3 %v1788_v45  ;;  %2179 = vmatpush.msrb.mxu1 %v1806_v10 }
 0x461   : > { %2265 = vmatpush.msrb.mxu2 %v2247_v26 }
 0x462   : > { %2088 = vmatpush.msra.mxu3 %v1787_v46  ;;  %2180 = vmatpush.msrb.mxu1 %v1805_v12 }
 0x463   : > { %2266 = vmatpush.msrb.mxu2 %v2246_v27 }
 0x464   : > { %2604 = vmatpush.msk.msrb.mxu3 %vm1859_vm6, %v3496_v11  ;;  %v1815_v11 = vld [vmem:[#allocation13 + $0x1e0] sm:$0xff]  ;;  %2181 = vmatpush.msrb.mxu1 %v1804_v14 }
 0x465   : > { %2267 = vmatpush.msrb.mxu2 %v2245_v28 }
 0x466   : > { %2182 = vmatpush.msrb.mxu1 %v1803_v16 }
 0x467   : > { %2268 = vmatpush.msrb.mxu2 %v2244_v29 }
 0x469   : > { %2269 = vmatpush.msrb.mxu2 %v2243_v30 }
 0x46b   : > { %2270 = vmatpush.msrb.mxu2 %v2242_v31 }
 0x46d   : > { %2271 = vmatpush.msrb.mxu2 %v2241_v34 }
 0x4d0   : > { %v1949_v58 = vpop.f32.mrf.mxu2 }
 0x4d2   : > { %v1996_v59 = vpop.f32.mrf.mxu1 }
 0x4d6   : > { %v1902_v61 = vpop.f32.mrf.mxu3 }
 0x4d7   : > { %v1905_v62 = vadd.f32 %v1902_v61, %v1853_v60  ;;  %v2743_v60 = vld [vmem:[%s3667_s16] ss:$0 sm:$0xff] }
 0x4d8   : > { %v2067_v0 = vpop.f32.mrf.mxu2 }
 0x4d9   : > { %v1952_v63 = vadd.f32 %v1949_v58, %v1905_v62  ;;  %2597 = vmatmul.msk.f32.vlgmr.msra.gmra.mxu3 %vm1831_vm8, %v2067_v0  ;;  %v2283_v58 = vld [vmem:[%s3666_s6 + $0x8] sm:$0xff] }
 0x4da   : > { %v2114_v1 = vpop.f32.mrf.mxu1  ;;  %2302 = vmatpush.msra.mxu3 %v2297_v32 }
 0x4db   : > { %v1999_v2 = vadd.f32 %v1996_v59, %v1952_v63  ;;  %2600 = vmatmul.msk.f32.vlgmr.msra.gmra.mxu2 %vm1831_vm8, %v2114_v1  ;;  %v2282_v59 = vld [vmem:[%s3666_s6] sm:$0xff] }
 0x4dc   : > { %2303 = vmatpush.msra.mxu3 %v2296_v33 }
 0x4de   : > { %v2020_v4 = vpop.f32.mrf.mxu3  ;;  %2304 = vmatpush.msra.mxu3 %v2295_v35 }
 0x4df   : > { %2594 = vmatmul.msk.f32.vlgmr.msra.gmra.mxu0 %vm1831_vm8, %v2020_v4  ;;  %v2744_v4 = vld [vmem:[#allocation2] ss:$0 sm:$0xff] }
 0x4e0   : > { %2222 = vmatpush.msra.mxu0 %v1818_v3  ;;  %2305 = vmatpush.msra.mxu3 %v2294_v36 }
 0x4e1   : > { %2605 = vmatmul.msk.f32.vlgmr.msrb.gmra.mxu3 %vm1855_vm7, %v1754_v6 }
 0x4e2   : > { %2223 = vmatpush.msra.mxu0 %v1817_v5  ;;  %2306 = vmatpush.msra.mxu3 %v2293_v37 }
 0x4e4   : > { %2224 = vmatpush.msra.mxu0 %v1816_v9  ;;  %2307 = vmatpush.msra.mxu3 %v2292_v38 }
 0x4e6   : > { %2225 = vmatpush.msra.mxu0 %v1815_v11  ;;  %2308 = vmatpush.msra.mxu3 %v2291_v40 }
 0x4e7   : > { %2602 = vmatmul.msk.f32.vlgmr.msrb.gmra.mxu0 %vm1855_vm7, %v1753_v7 }
 0x4e8   : > { %2226 = vmatpush.msra.mxu0 %v1814_v13  ;;  %2309 = vmatpush.msra.mxu3 %v2290_v51 }
 0x4ea   : > { %2227 = vmatpush.msra.mxu0 %v1813_v15  ;;  %2310 = vmatpush.msra.mxu3 %v2289_v52 }
 0x4ec   : > { %2228 = vmatpush.msra.mxu0 %v1812_v17  ;;  %2311 = vmatpush.msra.mxu3 %v2288_v53 }
 0x4ee   : > { %2229 = vmatpush.msra.mxu0 %v1811_v18  ;;  %2312 = vmatpush.msra.mxu3 %v2287_v54 }
 0x4f0   : > { %2313 = vmatpush.msra.mxu3 %v2286_v55 }
 0x4f2   : > { %2314 = vmatpush.msra.mxu3 %v2285_v56 }
 0x4f4   : > { %2315 = vmatpush.msra.mxu3 %v2284_v57 }
 0x4f6   : > { %2316 = vmatpush.msra.mxu3 %v2283_v58 }
 0x4f8   : > { %2317 = vmatpush.msra.mxu3 %v2282_v59 }
 0x55c   : > { %v2043_v19 = vpop.f32.mrf.mxu0  ;;  %v2090_v21 = vpop.f32.mrf.mxu3 }
 0x55d   : > { %v2046_v20 = vadd.f32 %v2043_v19, %v1999_v2 }
 0x55e   : > { %v2137_v39 = vpop.f32.mrf.mxu2 }
 0x55f   : > { %v2093_v22 = vadd.f32 %v2090_v21, %v2046_v20 }
 0x561   : > { %v2140_v41 = vadd.f32 %v2137_v39, %v2093_v22 }
 0x564   : > { %v2161_v23 = vpop.f32.mrf.mxu0  ;;  %v2208_v24 = vpop.f32.mrf.mxu3 }
 0x565   : > { %2603 = vmatmul.msk.f32.vlgmr.msrb.gmra.mxu1 %vm1831_vm8, %v2161_v23  ;;  %2606 = vmatmul.msk.f32.vlgmr.msra.gmra.mxu0 %vm1831_vm8, %v2208_v24 }
 0x5e2   : > { %v2184_v42 = vpop.f32.mrf.mxu1  ;;  %v2231_v44 = vpop.f32.mrf.mxu0 }
 0x5e3   : > { %v2187_v43 = vadd.f32 %v2184_v42, %v2140_v41 }
 0x5e5   : > { %v2234_v45 = vadd.f32 %v2231_v44, %v2187_v43 }
 0x5e7   : > { %v2236_v46 = vmin.f32 %v2234_v45, 0.0  ;;  %vm2235_vm9 = vcmp.gt.f32.partialorder %v2234_v45, 0.0 }
 0x5e9   : > { %v2237_v47 = vmul.f32 1.442695, %v2236_v46 }
 0x5eb   : > { %2751 = vpow2.f32 %v2237_v47 }
 0x5f1   : > { %v2752_v48 = vpop.eup %2751 }
 0x5f2   : > { %v2607_v49 = vadd.f32 -1.0, %v2752_v48 }
 0x5f4   : > { %v2240_v50 = vsel %vm2235_vm9, %v2234_v45, %v2607_v49 }
 0x5f5   : > { %2608 = vmatmul.msk.f32.vlgmr.msrb.gmra.mxu2 %vm1831_vm8, %v2240_v50 }
 0x678   : > { %v2273_v61 = vpop.f32.mrf.mxu2 }
 0x679   : > { %v2274_v62 = vadd.f32 %v2743_v60, %v2273_v61 }
 0x67b   : > { %v2277_v63 = vmin.f32 %v2274_v62, 0.0  ;;  %vm2276_vm10 = vcmp.gt.f32.partialorder %v2274_v62, 0.0 }
 0x67d   : > { %v2278_v0 = vmul.f32 1.442695, %v2277_v63 }
 0x67f   : > { %2753 = vpow2.f32 %v2278_v0 }
 0x685   : > { %v2754_v1 = vpop.eup %2753 }
 0x686   : > { %v2609_v2 = vadd.f32 -1.0, %v2754_v1 }
 0x688   : > { %v2281_v3 = vsel %vm2276_vm10, %v2274_v62, %v2609_v2 }
 0x689   : > { %2318 = vmatmul.f32.vlgmr.msra.gmra.mxu3 %v2281_v3 }
 0x70c   : > { %v2319_v5 = vpop.f32.mrf.mxu3 }
 0x70d   : > { %v2320_v6 = vadd.f32 %v2744_v4, %v2319_v5 }
 0x70f   : > { %v2323_v7 = vsel %vm2322_vm11, %v2320_v6, 0.0 }
 0x710   : > { %v2324_v8 = vrot.slane %v2323_v7, 4 }
 0x712   : > { %v2325_v9 = vadd.f32 %v2324_v8, %v2323_v7 }
 0x714   : > { %v2326_v10 = vrot.slane %v2325_v9, 2 }
 0x716   : > { %v2327_v11 = vadd.f32 %v2326_v10, %v2325_v9 }
 0x718   : > { %v2328_v12 = vrot.slane %v2327_v11, 1 }
 0x71a   : > { %v2329_v13 = vadd.f32 %v2328_v12, %v2327_v11 }
 0x71c   : > { %v2610_v14 = vmul.f32 -0.25, %v2329_v13 }
 0x71e   : > { %v2332_v15 = vmul.f32 1.442695, %v2610_v14 }
 0x720   : > { %2755 = vpow2.f32 %v2332_v15 }
 0x726   : > { %v2756_v16 = vpop.eup %2755 }
 0x727   : > { %v2334_v17 = vadd.f32 1.0, %v2756_v16 }
 0x729   : > { %2757 = vrcp.f32 %v2334_v17  ;;  %v2346_v21 = vand.u32 2147483648, %v2334_v17  ;;  %v2344_v23 = vand.u32 2147483647, %v2334_v17  ;;  %vm2340_vm13 = vweird.f32 %v2334_v17 }
 0x72b   : > { %v2347_v25 = vor.u32 1.1754944e-38, %v2346_v21  ;;  %vm2345_vm0 = vcmp.eq.f32.partialorder %v2344_v23, 8.507059e+37 }
 0x72f   : > { %v2758_v18 = vpop.eup %2757 }
 0x730   : > { %v2336_v19 = vmul.f32 %v2758_v18, %v2334_v17  ;;  %vm2341_vm12 = vweird.f32 %v2758_v18 }
 0x731   : > { %vm2342_vm14 = vmor %vm2340_vm13, %vm2341_vm12 }
 0x732   : > { %v2337_v20 = vsub.f32 1.0, %v2336_v19 }
 0x734   : > { %v2338_v22 = vmul.f32 %v2758_v18, %v2337_v20 }
 0x736   : > { %v2339_v24 = vadd.f32 %v2758_v18, %v2338_v22 }
 0x738   : > { %v2343_v26 = vsel %vm2342_vm14, %v2758_v18, %v2339_v24 }
 0x739   : > { %v2348_v27 = vsel %vm2345_vm0, %v2347_v25, %v2343_v26 }
 0x73a   : > { %2351 = vst.msk [vmem:[%s844_s21] sm:$0x1] %vm2350_vm15, %v2348_v27 }
 0x73b PF: > { %p37_p1 = scmp.ge.s32.totalorder %s3257_s29, 4   ;;  %s3669_s26 = smov %s3041_s27 }
 0x73c   : > { %s3670_s27 = smov %s3045_s3  ;;  %s3671_s3 = smov %s3268_s19 }
 0x73d   : > { %s3672_s28 = smov %s3257_s29  ;;  %39 = sbr.rel (!%p37_p1) target bundleno = 20 (0x14), region = 181 }
 0x742   :  { %2369 = vsyncpa [#allocation4], 1 }
 0x743   :  { %2371 = vsyncpa [#allocation4 + $0x1], 1 }
 0x744   :  { %2372 = vsyncpa [#allocation6], 1 }
 0x745   :  { %2373 = vsyncpa [#allocation9], 1 }
 0x746   :  { %2374 = vsyncpa [#allocation12], 1 }
 0x747   :  { %2375 = vsyncpa [#allocation15], 1 }

</bundles_post_ra>
